<compile_context>
chip_gen: v6e
topology: v6e:2x2x1
jax: 0.10.0
libtpu: 0.0.40
codegen_flags: <defaults>
</compile_context>

<pallas_src>
import functools
import math

import jax
import jax.numpy as jnp
from jax.experimental import pallas as pl
from jax.experimental.pallas import tpu as pltpu


def _self_attn_kernel(num_heads, flat_out, flat_attn,
                      x_ref, q_ref, m_ref,
                      wq_ref, bq_ref, wk_ref, bk_ref, wv_ref, bv_ref,
                      wo_ref, bo_ref, wz_ref, bz_ref,
                      out_ref, attn_ref, ctx_ref):
    # x_ref : (TB, S,  D)   keys / values source (native dtype)
    # q_ref : (TB, Sq, D)   query source         (native dtype)
    # m_ref : (TB, 1,  S)   int32 mask, 0 = masked out
    # w*_ref: pre-transposed weights so the kernel does x @ W; b*_ref: (1, D)/(1, O)
    # out_ref : (TB, Sq, O) or (TB, 1, Sq*O)      (flat_out)
    # attn_ref: (TB, H, Sq, S) or (TB, H, Sq*S)   (flat_attn)
    # ctx_ref : VMEM scratch (TB*Sq, D), native dtype — head-merged context.
    f32 = jnp.float32
    TB, S, D = x_ref.shape
    Sq = q_ref.shape[1]
    H = num_heads
    dk = D // H
    O = wz_ref.shape[1]
    scale = 1.0 / math.sqrt(dk)
    in_dtype = x_ref.dtype

    x2 = x_ref[...].reshape(TB * S, D)            # native dtype, no upcast
    q2 = q_ref[...].reshape(TB * Sq, D)

    # QKV projections: K=D matmuls, f32 accumulation, result kept in the native
    # dtype so the attention matmuls feed the MXU at full rate (bf16 inputs).
    q_p = (jnp.dot(q2, wq_ref[...], preferred_element_type=f32)
           + bq_ref[...].astype(f32)).astype(in_dtype).reshape(TB, Sq, D)
    k_p = (jnp.dot(x2, wk_ref[...], preferred_element_type=f32)
           + bk_ref[...].astype(f32)).astype(in_dtype).reshape(TB, S, D)
    v_p = (jnp.dot(x2, wv_ref[...], preferred_element_type=f32)
           + bv_ref[...].astype(f32)).astype(in_dtype).reshape(TB, S, D)

    # Additive mask bias, computed and broadcast ONCE (JAX does not CSE
    # broadcast_in_dim). Finite value avoids the -inf NaN path for rows with
    # every key masked (they degrade to a uniform distribution instead).
    bias = jnp.where(m_ref[...] == 0, jnp.float32(-1e30), jnp.float32(0.0))
    bias = jnp.broadcast_to(bias, (TB, Sq, S))    # (TB, Sq, S)

    for h in range(H):
        sl = slice(h * dk, (h + 1) * dk)
        qh = q_p[:, :, sl]                        # (TB, Sq, dk)
        kh = k_p[:, :, sl]                        # (TB, S,  dk)
        vh = v_p[:, :, sl]                        # (TB, S,  dk)

        s = jnp.einsum('bqd,bkd->bqk', qh, kh,
                       preferred_element_type=f32)            # (TB, Sq, S)
        s = s * scale + bias

        s_max = jnp.max(s, axis=-1, keepdims=True)
        e = jnp.exp(s - s_max)
        p = e * pl.reciprocal(jnp.sum(e, axis=-1, keepdims=True), approx=True)

        if flat_attn:
            attn_ref[:, h, :] = p.reshape(TB, Sq * S).astype(attn_ref.dtype)
        else:
            attn_ref[:, h, :, :] = p.astype(attn_ref.dtype)

        ctx_h = jnp.einsum('bqk,bkd->bqd', p.astype(in_dtype), vh,
                           preferred_element_type=f32)        # (TB, Sq, dk)
        # Assemble heads into one (TB*Sq, D) VMEM buffer -> single Wo matmul.
        ctx_ref[:, sl] = ctx_h.reshape(TB * Sq, dk).astype(ctx_ref.dtype)

    # feature = ctx @ Wo^T + bo  (one K=D matmul), then out_layer.
    feat = (jnp.dot(ctx_ref[...], wo_ref[...], preferred_element_type=f32)
            + bo_ref[...].astype(f32))                        # (TB*Sq, D) f32
    out = (jnp.dot(feat.astype(wz_ref.dtype), wz_ref[...],
                   preferred_element_type=f32)
           + bz_ref[...].astype(f32))                         # (TB*Sq, O) f32

    if flat_out:
        out_ref[...] = out.reshape(TB, 1, Sq * O).astype(out_ref.dtype)
    else:
        out_ref[...] = out.reshape(TB, Sq, O).astype(out_ref.dtype)


def _vmem_limit_bytes():
    """Generation-aware scoped-VMEM limit (v5e/v6e: 128 MiB, v7x: 64 MiB/TC)."""
    try:
        cap = int(pltpu.get_tpu_info().vmem_capacity_bytes)
    except Exception:
        cap = 64 * 1024 * 1024            # conservative (v7x per-TensorCore)
    if cap >= 96 * 1024 * 1024:           # v5e / v6e class
        return 64 * 1024 * 1024
    return 48 * 1024 * 1024               # v7x class


def _pick_batch_tile(B, S, Sq, D, H, O, in_itemsize, out_itemsize, budget_bytes):
    """Largest divisor of B (capped at B//2 so the grid has >= 2 iterations)
    whose per-step working set — pipelined I/O blocks plus f32 intermediates —
    fits inside the VMEM budget."""
    cap = max(1, B // 2)

    def step_bytes(tb):
        io = 2 * (tb * (S + Sq) * D * in_itemsize        # x, q (double-buffered)
                  + tb * S * 4                           # int32 mask
                  + tb * (Sq * O + H * Sq * S) * out_itemsize)   # out, attn
        interm = 4 * tb * ((Sq + 2 * S) * D              # q_p, k_p, v_p
                           + 2 * Sq * D                  # ctx scratch + feat
                           + 4 * Sq * S                  # bias + scores/exp/p
                           + Sq * O)                     # out (f32)
        return io + interm

    tb = 1
    for cand in range(1, cap + 1):
        if B % cand == 0 and step_bytes(cand) <= budget_bytes:
            tb = cand
    return tb


def self_attention_feature_extract(inputs, query, mask, params, num_heads):
    """inputs: (B, S, D) keys/values, query: (B, Sq, D), mask: (B, S) (0 = drop).
    params: PyTorch-convention weights (out, in) and biases.
    Returns (out (B*Sq, O), attn (B, H, Sq, S)) matching the PyTorch module."""
    B, S, D = inputs.shape
    Bq, Sq, Dq = query.shape
    assert (Bq, Dq) == (B, D)
    H = num_heads
    assert D % H == 0
    O = params['w_out'].shape[0]

    # Pre-transpose weights so the kernel computes x @ W (no in-kernel transposes).
    wq_t, wk_t, wv_t = params['wq'].T, params['wk'].T, params['wv'].T
    wo_t = params['wo'].T                                   # (D, D)
    wz_t = params['w_out'].T                                # (D, O)
    bq = params['bq'].reshape(1, D)
    bk = params['bk'].reshape(1, D)
    bv = params['bv'].reshape(1, D)
    bo = params['bo'].reshape(1, D)
    bz = params['b_out'].reshape(1, O)

    m = mask.reshape(B, 1, S).astype(jnp.int32)

    out_dtype = inputs.dtype
    in_itemsize = jnp.dtype(inputs.dtype).itemsize
    out_itemsize = jnp.dtype(out_dtype).itemsize
    w_itemsize = jnp.dtype(wq_t.dtype).itemsize

    vmem_limit = _vmem_limit_bytes()
    weight_bytes = (4 * D * D + D * O + 4 * D + O) * w_itemsize
    budget = max(vmem_limit - 2 * weight_bytes - (4 << 20), 1 << 20)
    TB = _pick_batch_tile(B, S, Sq, D, H, O, in_itemsize, out_itemsize, budget)
    grid = (B // TB,)

    # Lane-dense output layouts when the natural last dim would be < 128.
    want_flat_out = O < 128
    want_flat_attn = S < 128

    def call(flat_out, flat_attn, single_buffer_w):
        wkw = dict(pipeline_mode=pl.Buffered(1)) if single_buffer_w else {}

        def wspec(shape):
            return pl.BlockSpec(shape, lambda b: (0, 0), **wkw)

        in_specs = [
            pl.BlockSpec((TB, S, D), lambda b: (b, 0, 0)),      # inputs (K/V)
            pl.BlockSpec((TB, Sq, D), lambda b: (b, 0, 0)),     # query
            pl.BlockSpec((TB, 1, S), lambda b: (b, 0, 0)),      # mask (int32)
            wspec((D, D)), wspec((1, D)),                       # Wq^T, bq
            wspec((D, D)), wspec((1, D)),                       # Wk^T, bk
            wspec((D, D)), wspec((1, D)),                       # Wv^T, bv
            wspec((D, D)), wspec((1, D)),                       # Wo^T, bo
            wspec((D, O)), wspec((1, O)),                       # Wout^T, bout
        ]

        if flat_out:
            out_shape0 = jax.ShapeDtypeStruct((B, 1, Sq * O), out_dtype)
            out_spec0 = pl.BlockSpec((TB, 1, Sq * O), lambda b: (b, 0, 0))
        else:
            out_shape0 = jax.ShapeDtypeStruct((B, Sq, O), out_dtype)
            out_spec0 = pl.BlockSpec((TB, Sq, O), lambda b: (b, 0, 0))

        if flat_attn:
            out_shape1 = jax.ShapeDtypeStruct((B, H, Sq * S), out_dtype)
            out_spec1 = pl.BlockSpec((TB, H, Sq * S), lambda b: (b, 0, 0))
        else:
            out_shape1 = jax.ShapeDtypeStruct((B, H, Sq, S), out_dtype)
            out_spec1 = pl.BlockSpec((TB, H, Sq, S), lambda b: (b, 0, 0, 0))

        return pl.pallas_call(
            functools.partial(_self_attn_kernel, H, flat_out, flat_attn),
            out_shape=(out_shape0, out_shape1),
            grid_spec=pltpu.PrefetchScalarGridSpec(
                num_scalar_prefetch=0,
                grid=grid,
                in_specs=in_specs,
                out_specs=[out_spec0, out_spec1],
                scratch_shapes=[pltpu.VMEM((TB * Sq, D), inputs.dtype)],
            ),
            compiler_params=pltpu.CompilerParams(
                dimension_semantics=("parallel",),
                vmem_limit_bytes=int(vmem_limit),
            ),
        )(inputs, query, m,
          wq_t, bq, wk_t, bk, wv_t, bv, wo_t, bo, wz_t, bz)

    try:
        out_raw, attn_raw = call(want_flat_out, want_flat_attn, True)
    except Exception:
        # Conservative fallback: default double-buffered weights and natural
        # (un-flattened) output layouts.
        out_raw, attn_raw = call(False, False, False)

    out = out_raw.reshape(B * Sq, O)
    attn = attn_raw.reshape(B, H, Sq, S)
    return out, attn


def _reference(inputs, query, mask, params, num_heads):
    B, S, D = inputs.shape
    Sq = query.shape[1]
    H = num_heads
    dk = D // H
    hp = jax.lax.Precision.HIGHEST

    def lin(x, w, b):
        return jnp.einsum('bsd,od->bso', x, w, precision=hp) + b

    q = lin(query, params['wq'], params['bq']).reshape(B, Sq, H, dk).transpose(0, 2, 1, 3)
    k = lin(inputs, params['wk'], params['bk']).reshape(B, S, H, dk).transpose(0, 2, 1, 3)
    v = lin(inputs, params['wv'], params['bv']).reshape(B, S, H, dk).transpose(0, 2, 1, 3)

    scores = jnp.einsum('bhqd,bhkd->bhqk', q, k, precision=hp) / math.sqrt(dk)
    m = mask.reshape(B, 1, 1, S)
    scores = jnp.where(m == 0, -jnp.inf, scores)
    attn = jax.nn.softmax(scores, axis=-1)
    ctx = jnp.einsum('bhqk,bhkd->bhqd', attn, v, precision=hp)
    ctx = ctx.transpose(0, 2, 1, 3).reshape(B, Sq, D)
    feat = jnp.einsum('bsd,od->bso', ctx, params['wo'], precision=hp) + params['bo']
    out = jnp.einsum('bsd,od->bso', feat, params['w_out'], precision=hp) + params['b_out']
    return out.reshape(B * Sq, -1), attn


if __name__ == "__main__":
    B, S, Sq, D, H, O = 2, 8, 8, 32, 4, 16
    key = jax.random.PRNGKey(0)
    keys = jax.random.split(key, 13)
    lim = 1.0 / math.sqrt(D)

    def uni(k, shape):
        return jax.random.uniform(k, shape, minval=-lim, maxval=lim, dtype=jnp.float32)

    params = dict(
        wq=uni(keys[0], (D, D)), bq=uni(keys[1], (D,)),
        wk=uni(keys[2], (D, D)), bk=uni(keys[3], (D,)),
        wv=uni(keys[4], (D, D)), bv=uni(keys[5], (D,)),
        wo=uni(keys[6], (D, D)), bo=uni(keys[7], (D,)),
        w_out=uni(keys[8], (O, D)), b_out=uni(keys[9], (O,)),
    )

    inputs = jax.random.normal(keys[10], (B, S, D), dtype=jnp.float32)
    query = jax.random.normal(keys[11], (B, Sq, D), dtype=jnp.float32)
    mask = (jax.random.uniform(keys[12], (B, S)) > 0.3).astype(jnp.float32)
    mask = mask.at[:, 0].set(1.0)   # guarantee >= 1 valid key per row (avoid NaN row)

    out, attn = self_attention_feature_extract(inputs, query, mask, params, H)
    jax.block_until_ready((out, attn))

    ref_out, ref_attn = _reference(inputs, query, mask, params, H)
    assert out.shape == (B * Sq, O), out.shape
    assert attn.shape == (B, H, Sq, S), attn.shape
    assert jnp.allclose(out, ref_out, atol=2e-3, rtol=2e-3), \
        float(jnp.max(jnp.abs(out - ref_out)))
    assert jnp.allclose(attn, ref_attn, atol=2e-3, rtol=2e-3), \
        float(jnp.max(jnp.abs(attn - ref_attn)))

    print("KERNEL_OK")
</pallas_src>

<mosaic_0001>
module attributes {stable_mosaic.version = 11 : i64} {
  func.func @_self_attn_kernel(%arg0: i32, %arg1: memref<1x8x32xf32, #tpu.memory_space<vmem>>, %arg2: memref<1x8x32xf32, #tpu.memory_space<vmem>>, %arg3: memref<1x1x8xi32, #tpu.memory_space<vmem>>, %arg4: memref<32x32xf32, #tpu.memory_space<vmem>>, %arg5: memref<1x32xf32, #tpu.memory_space<vmem>>, %arg6: memref<32x32xf32, #tpu.memory_space<vmem>>, %arg7: memref<1x32xf32, #tpu.memory_space<vmem>>, %arg8: memref<32x32xf32, #tpu.memory_space<vmem>>, %arg9: memref<1x32xf32, #tpu.memory_space<vmem>>, %arg10: memref<32x32xf32, #tpu.memory_space<vmem>>, %arg11: memref<1x32xf32, #tpu.memory_space<vmem>>, %arg12: memref<32x16xf32, #tpu.memory_space<vmem>>, %arg13: memref<1x16xf32, #tpu.memory_space<vmem>>, %arg14: memref<1x1x128xf32, #tpu.memory_space<vmem>>, %arg15: memref<1x4x64xf32, #tpu.memory_space<vmem>>, %arg16: memref<8x32xf32, #tpu.memory_space<vmem>>) attributes {dimension_semantics = [#tpu.dimension_semantics<parallel>], iteration_bounds = array<i64: 2>, scalar_prefetch = 0 : i64, scratch_operands = 1 : i64, tpu.core_type = #tpu.core_type<tc>, window_params = [{transform_indices = @transform_0, window_bounds = array<i64: 1, 8, 32>}, {transform_indices = @transform_1, window_bounds = array<i64: 1, 8, 32>}, {transform_indices = @transform_2, window_bounds = array<i64: 1, 1, 8>}, {pipeline_mode = #tpu.pipeline_mode<synchronous>, transform_indices = @transform_3, window_bounds = array<i64: 32, 32>}, {pipeline_mode = #tpu.pipeline_mode<synchronous>, transform_indices = @transform_4, window_bounds = array<i64: 1, 32>}, {pipeline_mode = #tpu.pipeline_mode<synchronous>, transform_indices = @transform_5, window_bounds = array<i64: 32, 32>}, {pipeline_mode = #tpu.pipeline_mode<synchronous>, transform_indices = @transform_6, window_bounds = array<i64: 1, 32>}, {pipeline_mode = #tpu.pipeline_mode<synchronous>, transform_indices = @transform_7, window_bounds = array<i64: 32, 32>}, {pipeline_mode = #tpu.pipeline_mode<synchronous>, transform_indices = @transform_8, window_bounds = array<i64: 1, 32>}, {pipeline_mode = #tpu.pipeline_mode<synchronous>, transform_indices = @transform_9, window_bounds = array<i64: 32, 32>}, {pipeline_mode = #tpu.pipeline_mode<synchronous>, transform_indices = @transform_10, window_bounds = array<i64: 1, 32>}, {pipeline_mode = #tpu.pipeline_mode<synchronous>, transform_indices = @transform_11, window_bounds = array<i64: 32, 16>}, {pipeline_mode = #tpu.pipeline_mode<synchronous>, transform_indices = @transform_12, window_bounds = array<i64: 1, 16>}, {transform_indices = @transform_13, window_bounds = array<i64: 1, 1, 128>}, {transform_indices = @transform_14, window_bounds = array<i64: 1, 4, 64>}]} {
    %c0 = arith.constant 0 : index
    %c0_0 = arith.constant 0 : index
    %c0_1 = arith.constant 0 : index
    %0 = vector.load %arg1[%c0, %c0_0, %c0_1] : memref<1x8x32xf32, #tpu.memory_space<vmem>>, vector<1x8x32xf32>
    %1 = vector.shape_cast %0 : vector<1x8x32xf32> to vector<8x32xf32>
    %c0_2 = arith.constant 0 : index
    %c0_3 = arith.constant 0 : index
    %c0_4 = arith.constant 0 : index
    %2 = vector.load %arg2[%c0_2, %c0_3, %c0_4] : memref<1x8x32xf32, #tpu.memory_space<vmem>>, vector<1x8x32xf32>
    %3 = vector.shape_cast %2 : vector<1x8x32xf32> to vector<8x32xf32>
    %c0_5 = arith.constant 0 : index
    %c0_6 = arith.constant 0 : index
    %4 = vector.load %arg4[%c0_5, %c0_6] : memref<32x32xf32, #tpu.memory_space<vmem>>, vector<32x32xf32>
    %cst = arith.constant dense<0.000000e+00> : vector<8x32xf32>
    %5 = tpu.matmul %3, %4, %cst {dimension_numbers = #tpu.dot_dimension_numbers<[1], [0], [0], [1], [0, 0, 1, 1], [], []>} : vector<8x32xf32>, vector<32x32xf32>, vector<8x32xf32> -> vector<8x32xf32>
    %c0_7 = arith.constant 0 : index
    %c0_8 = arith.constant 0 : index
    %6 = vector.load %arg5[%c0_7, %c0_8] : memref<1x32xf32, #tpu.memory_space<vmem>>, vector<1x32xf32>
    %7 = vector.broadcast %6 : vector<1x32xf32> to vector<8x32xf32>
    %8 = arith.addf %5, %7 : vector<8x32xf32>
    %9 = vector.shape_cast %8 : vector<8x32xf32> to vector<1x8x32xf32>
    %c0_9 = arith.constant 0 : index
    %c0_10 = arith.constant 0 : index
    %10 = vector.load %arg6[%c0_9, %c0_10] : memref<32x32xf32, #tpu.memory_space<vmem>>, vector<32x32xf32>
    %cst_11 = arith.constant dense<0.000000e+00> : vector<8x32xf32>
    %11 = tpu.matmul %1, %10, %cst_11 {dimension_numbers = #tpu.dot_dimension_numbers<[1], [0], [0], [1], [0, 0, 1, 1], [], []>} : vector<8x32xf32>, vector<32x32xf32>, vector<8x32xf32> -> vector<8x32xf32>
    %c0_12 = arith.constant 0 : index
    %c0_13 = arith.constant 0 : index
    %12 = vector.load %arg7[%c0_12, %c0_13] : memref<1x32xf32, #tpu.memory_space<vmem>>, vector<1x32xf32>
    %13 = vector.broadcast %12 : vector<1x32xf32> to vector<8x32xf32>
    %14 = arith.addf %11, %13 : vector<8x32xf32>
    %15 = vector.shape_cast %14 : vector<8x32xf32> to vector<1x8x32xf32>
    %c0_14 = arith.constant 0 : index
    %c0_15 = arith.constant 0 : index
    %16 = vector.load %arg8[%c0_14, %c0_15] : memref<32x32xf32, #tpu.memory_space<vmem>>, vector<32x32xf32>
    %cst_16 = arith.constant dense<0.000000e+00> : vector<8x32xf32>
    %17 = tpu.matmul %1, %16, %cst_16 {dimension_numbers = #tpu.dot_dimension_numbers<[1], [0], [0], [1], [0, 0, 1, 1], [], []>} : vector<8x32xf32>, vector<32x32xf32>, vector<8x32xf32> -> vector<8x32xf32>
    %c0_17 = arith.constant 0 : index
    %c0_18 = arith.constant 0 : index
    %18 = vector.load %arg9[%c0_17, %c0_18] : memref<1x32xf32, #tpu.memory_space<vmem>>, vector<1x32xf32>
    %19 = vector.broadcast %18 : vector<1x32xf32> to vector<8x32xf32>
    %20 = arith.addf %17, %19 : vector<8x32xf32>
    %21 = vector.shape_cast %20 : vector<8x32xf32> to vector<1x8x32xf32>
    %c0_19 = arith.constant 0 : index
    %c0_20 = arith.constant 0 : index
    %c0_21 = arith.constant 0 : index
    %22 = vector.load %arg3[%c0_19, %c0_20, %c0_21] : memref<1x1x8xi32, #tpu.memory_space<vmem>>, vector<1x1x8xi32>
    %c0_i32 = arith.constant 0 : i32
    %23 = vector.broadcast %c0_i32 : i32 to vector<1x1x8xi32>
    %24 = arith.cmpi eq, %22, %23 : vector<1x1x8xi32>
    %cst_22 = arith.constant -1.000000e+30 : f32
    %cst_23 = arith.constant 0.000000e+00 : f32
    %25 = vector.broadcast %cst_22 : f32 to vector<1x1x8xf32>
    %26 = vector.broadcast %cst_23 : f32 to vector<1x1x8xf32>
    %27 = arith.select %24, %25, %26 : vector<1x1x8xi1>, vector<1x1x8xf32>
    %28 = vector.shape_cast %27 : vector<1x1x8xf32> to vector<1x1x8xf32>
    %29 = vector.broadcast %28 : vector<1x1x8xf32> to vector<1x8x8xf32>
    %30 = vector.extract_strided_slice %9 {offsets = [0, 0, 0], sizes = [1, 8, 8], strides = [1, 1, 1]} : vector<1x8x32xf32> to vector<1x8x8xf32>
    %31 = vector.extract_strided_slice %15 {offsets = [0, 0, 0], sizes = [1, 8, 8], strides = [1, 1, 1]} : vector<1x8x32xf32> to vector<1x8x8xf32>
    %32 = vector.extract_strided_slice %21 {offsets = [0, 0, 0], sizes = [1, 8, 8], strides = [1, 1, 1]} : vector<1x8x32xf32> to vector<1x8x8xf32>
    "tpu.trace_start"() <{level = 10 : i32, message = "bqd,bkd->bqk"}> : () -> ()
    %cst_24 = arith.constant dense<0.000000e+00> : vector<1x8x8xf32>
    %33 = tpu.matmul %30, %31, %cst_24 {dimension_numbers = #tpu.dot_dimension_numbers<[2], [2], [1], [1], [0, 0, 0, 1, 1, 1], [0], [0]>} : vector<1x8x8xf32>, vector<1x8x8xf32>, vector<1x8x8xf32> -> vector<1x8x8xf32>
    "tpu.trace_stop"() : () -> ()
    %cst_25 = arith.constant 0.353553385 : f32
    %34 = vector.broadcast %cst_25 : f32 to vector<1x8x8xf32>
    %35 = arith.mulf %33, %34 : vector<1x8x8xf32>
    %36 = arith.addf %35, %29 : vector<1x8x8xf32>
    %cst_26 = arith.constant dense<0xFF800000> : vector<1x8xf32>
    %37 = vector.multi_reduction <maximumf>, %36, %cst_26 [2] : vector<1x8x8xf32> to vector<1x8xf32>
    %38 = vector.shape_cast %37 : vector<1x8xf32> to vector<1x8x1xf32>
    %39 = vector.broadcast %38 : vector<1x8x1xf32> to vector<1x8x8xf32>
    %40 = arith.subf %36, %39 : vector<1x8x8xf32>
    %41 = math.exp %40 : vector<1x8x8xf32>
    %cst_27 = arith.constant dense<0.000000e+00> : vector<1x8xf32>
    %42 = vector.multi_reduction <add>, %41, %cst_27 [2] : vector<1x8x8xf32> to vector<1x8xf32>
    %43 = vector.shape_cast %42 : vector<1x8xf32> to vector<1x8x1xf32>
    %44 = tpu.reciprocal %43 {approx = true} : vector<1x8x1xf32> -> vector<1x8x1xf32>
    %45 = vector.broadcast %44 : vector<1x8x1xf32> to vector<1x8x8xf32>
    %46 = arith.mulf %41, %45 : vector<1x8x8xf32>
    %47 = vector.shape_cast %46 : vector<1x8x8xf32> to vector<1x64xf32>
    %c0_28 = arith.constant 0 : index
    %c0_29 = arith.constant 0 : index
    %c0_30 = arith.constant 0 : index
    %48 = vector.load %arg15[%c0_28, %c0_29, %c0_30] : memref<1x4x64xf32, #tpu.memory_space<vmem>>, vector<1x1x64xf32>
    %49 = vector.shape_cast %48 : vector<1x1x64xf32> to vector<1x64xf32>
    %50 = vector.shape_cast %47 : vector<1x64xf32> to vector<1x1x64xf32>
    tpu.vector_store %arg15[%c0_28, %c0_29, %c0_30], %50 {strides = array<i32>} : memref<1x4x64xf32, #tpu.memory_space<vmem>>, vector<1x1x64xf32>,
    "tpu.trace_start"() <{level = 10 : i32, message = "bqk,bkd->bqd"}> : () -> ()
    %cst_31 = arith.constant dense<0.000000e+00> : vector<1x8x8xf32>
    %51 = tpu.matmul %46, %32, %cst_31 {dimension_numbers = #tpu.dot_dimension_numbers<[2], [1], [1], [2], [0, 0, 0, 1, 1, 2], [0], [0]>} : vector<1x8x8xf32>, vector<1x8x8xf32>, vector<1x8x8xf32> -> vector<1x8x8xf32>
    "tpu.trace_stop"() : () -> ()
    %52 = vector.shape_cast %51 : vector<1x8x8xf32> to vector<8x8xf32>
    %c0_32 = arith.constant 0 : index
    %c0_33 = arith.constant 0 : index
    %53 = vector.load %arg16[%c0_32, %c0_33] : memref<8x32xf32, #tpu.memory_space<vmem>>, vector<8x8xf32>
    tpu.vector_store %arg16[%c0_32, %c0_33], %52 {strides = array<i32>} : memref<8x32xf32, #tpu.memory_space<vmem>>, vector<8x8xf32>,
    %54 = vector.extract_strided_slice %9 {offsets = [0, 0, 8], sizes = [1, 8, 8], strides = [1, 1, 1]} : vector<1x8x32xf32> to vector<1x8x8xf32>
    %55 = vector.extract_strided_slice %15 {offsets = [0, 0, 8], sizes = [1, 8, 8], strides = [1, 1, 1]} : vector<1x8x32xf32> to vector<1x8x8xf32>
    %56 = vector.extract_strided_slice %21 {offsets = [0, 0, 8], sizes = [1, 8, 8], strides = [1, 1, 1]} : vector<1x8x32xf32> to vector<1x8x8xf32>
    "tpu.trace_start"() <{level = 10 : i32, message = "bqd,bkd->bqk"}> : () -> ()
    %cst_34 = arith.constant dense<0.000000e+00> : vector<1x8x8xf32>
    %57 = tpu.matmul %54, %55, %cst_34 {dimension_numbers = #tpu.dot_dimension_numbers<[2], [2], [1], [1], [0, 0, 0, 1, 1, 1], [0], [0]>} : vector<1x8x8xf32>, vector<1x8x8xf32>, vector<1x8x8xf32> -> vector<1x8x8xf32>
    "tpu.trace_stop"() : () -> ()
    %cst_35 = arith.constant 0.353553385 : f32
    %58 = vector.broadcast %cst_35 : f32 to vector<1x8x8xf32>
    %59 = arith.mulf %57, %58 : vector<1x8x8xf32>
    %60 = arith.addf %59, %29 : vector<1x8x8xf32>
    %cst_36 = arith.constant dense<0xFF800000> : vector<1x8xf32>
    %61 = vector.multi_reduction <maximumf>, %60, %cst_36 [2] : vector<1x8x8xf32> to vector<1x8xf32>
    %62 = vector.shape_cast %61 : vector<1x8xf32> to vector<1x8x1xf32>
    %63 = vector.broadcast %62 : vector<1x8x1xf32> to vector<1x8x8xf32>
    %64 = arith.subf %60, %63 : vector<1x8x8xf32>
    %65 = math.exp %64 : vector<1x8x8xf32>
    %cst_37 = arith.constant dense<0.000000e+00> : vector<1x8xf32>
    %66 = vector.multi_reduction <add>, %65, %cst_37 [2] : vector<1x8x8xf32> to vector<1x8xf32>
    %67 = vector.shape_cast %66 : vector<1x8xf32> to vector<1x8x1xf32>
    %68 = tpu.reciprocal %67 {approx = true} : vector<1x8x1xf32> -> vector<1x8x1xf32>
    %69 = vector.broadcast %68 : vector<1x8x1xf32> to vector<1x8x8xf32>
    %70 = arith.mulf %65, %69 : vector<1x8x8xf32>
    %71 = vector.shape_cast %70 : vector<1x8x8xf32> to vector<1x64xf32>
    %c0_38 = arith.constant 0 : index
    %c1 = arith.constant 1 : index
    %c0_39 = arith.constant 0 : index
    %72 = vector.load %arg15[%c0_38, %c1, %c0_39] : memref<1x4x64xf32, #tpu.memory_space<vmem>>, vector<1x1x64xf32>
    %73 = vector.shape_cast %72 : vector<1x1x64xf32> to vector<1x64xf32>
    %74 = vector.shape_cast %71 : vector<1x64xf32> to vector<1x1x64xf32>
    tpu.vector_store %arg15[%c0_38, %c1, %c0_39], %74 {strides = array<i32>} : memref<1x4x64xf32, #tpu.memory_space<vmem>>, vector<1x1x64xf32>,
    "tpu.trace_start"() <{level = 10 : i32, message = "bqk,bkd->bqd"}> : () -> ()
    %cst_40 = arith.constant dense<0.000000e+00> : vector<1x8x8xf32>
    %75 = tpu.matmul %70, %56, %cst_40 {dimension_numbers = #tpu.dot_dimension_numbers<[2], [1], [1], [2], [0, 0, 0, 1, 1, 2], [0], [0]>} : vector<1x8x8xf32>, vector<1x8x8xf32>, vector<1x8x8xf32> -> vector<1x8x8xf32>
    "tpu.trace_stop"() : () -> ()
    %76 = vector.shape_cast %75 : vector<1x8x8xf32> to vector<8x8xf32>
    %c0_41 = arith.constant 0 : index
    %c8 = arith.constant 8 : index
    %77 = vector.load %arg16[%c0_41, %c8] : memref<8x32xf32, #tpu.memory_space<vmem>>, vector<8x8xf32>
    tpu.vector_store %arg16[%c0_41, %c8], %76 {strides = array<i32>} : memref<8x32xf32, #tpu.memory_space<vmem>>, vector<8x8xf32>,
    %78 = vector.extract_strided_slice %9 {offsets = [0, 0, 16], sizes = [1, 8, 8], strides = [1, 1, 1]} : vector<1x8x32xf32> to vector<1x8x8xf32>
    %79 = vector.extract_strided_slice %15 {offsets = [0, 0, 16], sizes = [1, 8, 8], strides = [1, 1, 1]} : vector<1x8x32xf32> to vector<1x8x8xf32>
    %80 = vector.extract_strided_slice %21 {offsets = [0, 0, 16], sizes = [1, 8, 8], strides = [1, 1, 1]} : vector<1x8x32xf32> to vector<1x8x8xf32>
    "tpu.trace_start"() <{level = 10 : i32, message = "bqd,bkd->bqk"}> : () -> ()
    %cst_42 = arith.constant dense<0.000000e+00> : vector<1x8x8xf32>
    %81 = tpu.matmul %78, %79, %cst_42 {dimension_numbers = #tpu.dot_dimension_numbers<[2], [2], [1], [1], [0, 0, 0, 1, 1, 1], [0], [0]>} : vector<1x8x8xf32>, vector<1x8x8xf32>, vector<1x8x8xf32> -> vector<1x8x8xf32>
    "tpu.trace_stop"() : () -> ()
    %cst_43 = arith.constant 0.353553385 : f32
    %82 = vector.broadcast %cst_43 : f32 to vector<1x8x8xf32>
    %83 = arith.mulf %81, %82 : vector<1x8x8xf32>
    %84 = arith.addf %83, %29 : vector<1x8x8xf32>
    %cst_44 = arith.constant dense<0xFF800000> : vector<1x8xf32>
    %85 = vector.multi_reduction <maximumf>, %84, %cst_44 [2] : vector<1x8x8xf32> to vector<1x8xf32>
    %86 = vector.shape_cast %85 : vector<1x8xf32> to vector<1x8x1xf32>
    %87 = vector.broadcast %86 : vector<1x8x1xf32> to vector<1x8x8xf32>
    %88 = arith.subf %84, %87 : vector<1x8x8xf32>
    %89 = math.exp %88 : vector<1x8x8xf32>
    %cst_45 = arith.constant dense<0.000000e+00> : vector<1x8xf32>
    %90 = vector.multi_reduction <add>, %89, %cst_45 [2] : vector<1x8x8xf32> to vector<1x8xf32>
    %91 = vector.shape_cast %90 : vector<1x8xf32> to vector<1x8x1xf32>
    %92 = tpu.reciprocal %91 {approx = true} : vector<1x8x1xf32> -> vector<1x8x1xf32>
    %93 = vector.broadcast %92 : vector<1x8x1xf32> to vector<1x8x8xf32>
    %94 = arith.mulf %89, %93 : vector<1x8x8xf32>
    %95 = vector.shape_cast %94 : vector<1x8x8xf32> to vector<1x64xf32>
    %c0_46 = arith.constant 0 : index
    %c2 = arith.constant 2 : index
    %c0_47 = arith.constant 0 : index
    %96 = vector.load %arg15[%c0_46, %c2, %c0_47] : memref<1x4x64xf32, #tpu.memory_space<vmem>>, vector<1x1x64xf32>
    %97 = vector.shape_cast %96 : vector<1x1x64xf32> to vector<1x64xf32>
    %98 = vector.shape_cast %95 : vector<1x64xf32> to vector<1x1x64xf32>
    tpu.vector_store %arg15[%c0_46, %c2, %c0_47], %98 {strides = array<i32>} : memref<1x4x64xf32, #tpu.memory_space<vmem>>, vector<1x1x64xf32>,
    "tpu.trace_start"() <{level = 10 : i32, message = "bqk,bkd->bqd"}> : () -> ()
    %cst_48 = arith.constant dense<0.000000e+00> : vector<1x8x8xf32>
    %99 = tpu.matmul %94, %80, %cst_48 {dimension_numbers = #tpu.dot_dimension_numbers<[2], [1], [1], [2], [0, 0, 0, 1, 1, 2], [0], [0]>} : vector<1x8x8xf32>, vector<1x8x8xf32>, vector<1x8x8xf32> -> vector<1x8x8xf32>
    "tpu.trace_stop"() : () -> ()
    %100 = vector.shape_cast %99 : vector<1x8x8xf32> to vector<8x8xf32>
    %c0_49 = arith.constant 0 : index
    %c16 = arith.constant 16 : index
    %101 = vector.load %arg16[%c0_49, %c16] : memref<8x32xf32, #tpu.memory_space<vmem>>, vector<8x8xf32>
    tpu.vector_store %arg16[%c0_49, %c16], %100 {strides = array<i32>} : memref<8x32xf32, #tpu.memory_space<vmem>>, vector<8x8xf32>,
    %102 = vector.extract_strided_slice %9 {offsets = [0, 0, 24], sizes = [1, 8, 8], strides = [1, 1, 1]} : vector<1x8x32xf32> to vector<1x8x8xf32>
    %103 = vector.extract_strided_slice %15 {offsets = [0, 0, 24], sizes = [1, 8, 8], strides = [1, 1, 1]} : vector<1x8x32xf32> to vector<1x8x8xf32>
    %104 = vector.extract_strided_slice %21 {offsets = [0, 0, 24], sizes = [1, 8, 8], strides = [1, 1, 1]} : vector<1x8x32xf32> to vector<1x8x8xf32>
    "tpu.trace_start"() <{level = 10 : i32, message = "bqd,bkd->bqk"}> : () -> ()
    %cst_50 = arith.constant dense<0.000000e+00> : vector<1x8x8xf32>
    %105 = tpu.matmul %102, %103, %cst_50 {dimension_numbers = #tpu.dot_dimension_numbers<[2], [2], [1], [1], [0, 0, 0, 1, 1, 1], [0], [0]>} : vector<1x8x8xf32>, vector<1x8x8xf32>, vector<1x8x8xf32> -> vector<1x8x8xf32>
    "tpu.trace_stop"() : () -> ()
    %cst_51 = arith.constant 0.353553385 : f32
    %106 = vector.broadcast %cst_51 : f32 to vector<1x8x8xf32>
    %107 = arith.mulf %105, %106 : vector<1x8x8xf32>
    %108 = arith.addf %107, %29 : vector<1x8x8xf32>
    %cst_52 = arith.constant dense<0xFF800000> : vector<1x8xf32>
    %109 = vector.multi_reduction <maximumf>, %108, %cst_52 [2] : vector<1x8x8xf32> to vector<1x8xf32>
    %110 = vector.shape_cast %109 : vector<1x8xf32> to vector<1x8x1xf32>
    %111 = vector.broadcast %110 : vector<1x8x1xf32> to vector<1x8x8xf32>
    %112 = arith.subf %108, %111 : vector<1x8x8xf32>
    %113 = math.exp %112 : vector<1x8x8xf32>
    %cst_53 = arith.constant dense<0.000000e+00> : vector<1x8xf32>
    %114 = vector.multi_reduction <add>, %113, %cst_53 [2] : vector<1x8x8xf32> to vector<1x8xf32>
    %115 = vector.shape_cast %114 : vector<1x8xf32> to vector<1x8x1xf32>
    %116 = tpu.reciprocal %115 {approx = true} : vector<1x8x1xf32> -> vector<1x8x1xf32>
    %117 = vector.broadcast %116 : vector<1x8x1xf32> to vector<1x8x8xf32>
    %118 = arith.mulf %113, %117 : vector<1x8x8xf32>
    %119 = vector.shape_cast %118 : vector<1x8x8xf32> to vector<1x64xf32>
    %c0_54 = arith.constant 0 : index
    %c3 = arith.constant 3 : index
    %c0_55 = arith.constant 0 : index
    %120 = vector.load %arg15[%c0_54, %c3, %c0_55] : memref<1x4x64xf32, #tpu.memory_space<vmem>>, vector<1x1x64xf32>
    %121 = vector.shape_cast %120 : vector<1x1x64xf32> to vector<1x64xf32>
    %122 = vector.shape_cast %119 : vector<1x64xf32> to vector<1x1x64xf32>
    tpu.vector_store %arg15[%c0_54, %c3, %c0_55], %122 {strides = array<i32>} : memref<1x4x64xf32, #tpu.memory_space<vmem>>, vector<1x1x64xf32>,
    "tpu.trace_start"() <{level = 10 : i32, message = "bqk,bkd->bqd"}> : () -> ()
    %cst_56 = arith.constant dense<0.000000e+00> : vector<1x8x8xf32>
    %123 = tpu.matmul %118, %104, %cst_56 {dimension_numbers = #tpu.dot_dimension_numbers<[2], [1], [1], [2], [0, 0, 0, 1, 1, 2], [0], [0]>} : vector<1x8x8xf32>, vector<1x8x8xf32>, vector<1x8x8xf32> -> vector<1x8x8xf32>
    "tpu.trace_stop"() : () -> ()
    %124 = vector.shape_cast %123 : vector<1x8x8xf32> to vector<8x8xf32>
    %c0_57 = arith.constant 0 : index
    %c24 = arith.constant 24 : index
    %125 = vector.load %arg16[%c0_57, %c24] : memref<8x32xf32, #tpu.memory_space<vmem>>, vector<8x8xf32>
    tpu.vector_store %arg16[%c0_57, %c24], %124 {strides = array<i32>} : memref<8x32xf32, #tpu.memory_space<vmem>>, vector<8x8xf32>,
    %c0_58 = arith.constant 0 : index
    %c0_59 = arith.constant 0 : index
    %126 = vector.load %arg16[%c0_58, %c0_59] : memref<8x32xf32, #tpu.memory_space<vmem>>, vector<8x32xf32>
    %c0_60 = arith.constant 0 : index
    %c0_61 = arith.constant 0 : index
    %127 = vector.load %arg10[%c0_60, %c0_61] : memref<32x32xf32, #tpu.memory_space<vmem>>, vector<32x32xf32>
    %cst_62 = arith.constant dense<0.000000e+00> : vector<8x32xf32>
    %128 = tpu.matmul %126, %127, %cst_62 {dimension_numbers = #tpu.dot_dimension_numbers<[1], [0], [0], [1], [0, 0, 1, 1], [], []>} : vector<8x32xf32>, vector<32x32xf32>, vector<8x32xf32> -> vector<8x32xf32>
    %c0_63 = arith.constant 0 : index
    %c0_64 = arith.constant 0 : index
    %129 = vector.load %arg11[%c0_63, %c0_64] : memref<1x32xf32, #tpu.memory_space<vmem>>, vector<1x32xf32>
    %130 = vector.broadcast %129 : vector<1x32xf32> to vector<8x32xf32>
    %131 = arith.addf %128, %130 : vector<8x32xf32>
    %c0_65 = arith.constant 0 : index
    %c0_66 = arith.constant 0 : index
    %132 = vector.load %arg12[%c0_65, %c0_66] : memref<32x16xf32, #tpu.memory_space<vmem>>, vector<32x16xf32>
    %cst_67 = arith.constant dense<0.000000e+00> : vector<8x16xf32>
    %133 = tpu.matmul %131, %132, %cst_67 {dimension_numbers = #tpu.dot_dimension_numbers<[1], [0], [0], [1], [0, 0, 1, 1], [], []>} : vector<8x32xf32>, vector<32x16xf32>, vector<8x16xf32> -> vector<8x16xf32>
    %c0_68 = arith.constant 0 : index
    %c0_69 = arith.constant 0 : index
    %134 = vector.load %arg13[%c0_68, %c0_69] : memref<1x16xf32, #tpu.memory_space<vmem>>, vector<1x16xf32>
    %135 = vector.broadcast %134 : vector<1x16xf32> to vector<8x16xf32>
    %136 = arith.addf %133, %135 : vector<8x16xf32>
    %137 = vector.shape_cast %136 : vector<8x16xf32> to vector<1x1x128xf32>
    %c0_70 = arith.constant 0 : index
    %c0_71 = arith.constant 0 : index
    %c0_72 = arith.constant 0 : index
    %138 = vector.load %arg14[%c0_70, %c0_71, %c0_72] : memref<1x1x128xf32, #tpu.memory_space<vmem>>, vector<1x1x128xf32>
    tpu.vector_store %arg14[%c0_70, %c0_71, %c0_72], %137 {strides = array<i32>} : memref<1x1x128xf32, #tpu.memory_space<vmem>>, vector<1x1x128xf32>,
    return
  }
  func.func @transform_0(%arg0: i32) -> (i32, i32, i32) {
    %c0_i32 = arith.constant 0 : i32
    %c0_i32_0 = arith.constant 0 : i32
    %c0_i32_1 = arith.constant 0 : i32
    return %arg0, %c0_i32, %c0_i32_0 : i32, i32, i32
  }
  func.func @transform_1(%arg0: i32) -> (i32, i32, i32) {
    %c0_i32 = arith.constant 0 : i32
    %c0_i32_0 = arith.constant 0 : i32
    %c0_i32_1 = arith.constant 0 : i32
    return %arg0, %c0_i32, %c0_i32_0 : i32, i32, i32
  }
  func.func @transform_2(%arg0: i32) -> (i32, i32, i32) {
    %c0_i32 = arith.constant 0 : i32
    %c0_i32_0 = arith.constant 0 : i32
    %c0_i32_1 = arith.constant 0 : i32
    return %arg0, %c0_i32, %c0_i32_0 : i32, i32, i32
  }
  func.func @transform_3(%arg0: i32) -> (i32, i32) {
    %c0_i32 = arith.constant 0 : i32
    %c0_i32_0 = arith.constant 0 : i32
    %c0_i32_1 = arith.constant 0 : i32
    return %c0_i32, %c0_i32_0 : i32, i32
  }
  func.func @transform_4(%arg0: i32) -> (i32, i32) {
    %c0_i32 = arith.constant 0 : i32
    %c0_i32_0 = arith.constant 0 : i32
    %c0_i32_1 = arith.constant 0 : i32
    return %c0_i32, %c0_i32_0 : i32, i32
  }
  func.func @transform_5(%arg0: i32) -> (i32, i32) {
    %c0_i32 = arith.constant 0 : i32
    %c0_i32_0 = arith.constant 0 : i32
    %c0_i32_1 = arith.constant 0 : i32
    return %c0_i32, %c0_i32_0 : i32, i32
  }
  func.func @transform_6(%arg0: i32) -> (i32, i32) {
    %c0_i32 = arith.constant 0 : i32
    %c0_i32_0 = arith.constant 0 : i32
    %c0_i32_1 = arith.constant 0 : i32
    return %c0_i32, %c0_i32_0 : i32, i32
  }
  func.func @transform_7(%arg0: i32) -> (i32, i32) {
    %c0_i32 = arith.constant 0 : i32
    %c0_i32_0 = arith.constant 0 : i32
    %c0_i32_1 = arith.constant 0 : i32
    return %c0_i32, %c0_i32_0 : i32, i32
  }
  func.func @transform_8(%arg0: i32) -> (i32, i32) {
    %c0_i32 = arith.constant 0 : i32
    %c0_i32_0 = arith.constant 0 : i32
    %c0_i32_1 = arith.constant 0 : i32
    return %c0_i32, %c0_i32_0 : i32, i32
  }
  func.func @transform_9(%arg0: i32) -> (i32, i32) {
    %c0_i32 = arith.constant 0 : i32
    %c0_i32_0 = arith.constant 0 : i32
    %c0_i32_1 = arith.constant 0 : i32
    return %c0_i32, %c0_i32_0 : i32, i32
  }
  func.func @transform_10(%arg0: i32) -> (i32, i32) {
    %c0_i32 = arith.constant 0 : i32
    %c0_i32_0 = arith.constant 0 : i32
    %c0_i32_1 = arith.constant 0 : i32
    return %c0_i32, %c0_i32_0 : i32, i32
  }
  func.func @transform_11(%arg0: i32) -> (i32, i32) {
    %c0_i32 = arith.constant 0 : i32
    %c0_i32_0 = arith.constant 0 : i32
    %c0_i32_1 = arith.constant 0 : i32
    return %c0_i32, %c0_i32_0 : i32, i32
  }
  func.func @transform_12(%arg0: i32) -> (i32, i32) {
    %c0_i32 = arith.constant 0 : i32
    %c0_i32_0 = arith.constant 0 : i32
    %c0_i32_1 = arith.constant 0 : i32
    return %c0_i32, %c0_i32_0 : i32, i32
  }
  func.func @transform_13(%arg0: i32) -> (i32, i32, i32) {
    %c0_i32 = arith.constant 0 : i32
    %c0_i32_0 = arith.constant 0 : i32
    %c0_i32_1 = arith.constant 0 : i32
    return %arg0, %c0_i32, %c0_i32_0 : i32, i32, i32
  }
  func.func @transform_14(%arg0: i32) -> (i32, i32, i32) {
    %c0_i32 = arith.constant 0 : i32
    %c0_i32_0 = arith.constant 0 : i32
    %c0_i32_1 = arith.constant 0 : i32
    return %arg0, %c0_i32, %c0_i32_0 : i32, i32, i32
  }
}

module attributes {stable_mosaic.version = 11 : i64} {
  func.func @_self_attn_kernel(%arg0: i32, %arg1: memref<1x8x32xf32, #tpu.memory_space<vmem>>, %arg2: memref<1x8x32xf32, #tpu.memory_space<vmem>>, %arg3: memref<1x1x8xi32, #tpu.memory_space<vmem>>, %arg4: memref<32x32xf32, #tpu.memory_space<vmem>>, %arg5: memref<1x32xf32, #tpu.memory_space<vmem>>, %arg6: memref<32x32xf32, #tpu.memory_space<vmem>>, %arg7: memref<1x32xf32, #tpu.memory_space<vmem>>, %arg8: memref<32x32xf32, #tpu.memory_space<vmem>>, %arg9: memref<1x32xf32, #tpu.memory_space<vmem>>, %arg10: memref<32x32xf32, #tpu.memory_space<vmem>>, %arg11: memref<1x32xf32, #tpu.memory_space<vmem>>, %arg12: memref<32x16xf32, #tpu.memory_space<vmem>>, %arg13: memref<1x16xf32, #tpu.memory_space<vmem>>, %arg14: memref<1x8x16xf32, #tpu.memory_space<vmem>>, %arg15: memref<1x4x8x8xf32, #tpu.memory_space<vmem>>, %arg16: memref<8x32xf32, #tpu.memory_space<vmem>>) attributes {dimension_semantics = [#tpu.dimension_semantics<parallel>], iteration_bounds = array<i64: 2>, scalar_prefetch = 0 : i64, scratch_operands = 1 : i64, tpu.core_type = #tpu.core_type<tc>, window_params = [{transform_indices = @transform_0, window_bounds = array<i64: 1, 8, 32>}, {transform_indices = @transform_1, window_bounds = array<i64: 1, 8, 32>}, {transform_indices = @transform_2, window_bounds = array<i64: 1, 1, 8>}, {pipeline_mode = #tpu.pipeline_mode<synchronous>, transform_indices = @transform_3, window_bounds = array<i64: 32, 32>}, {pipeline_mode = #tpu.pipeline_mode<synchronous>, transform_indices = @transform_4, window_bounds = array<i64: 1, 32>}, {pipeline_mode = #tpu.pipeline_mode<synchronous>, transform_indices = @transform_5, window_bounds = array<i64: 32, 32>}, {pipeline_mode = #tpu.pipeline_mode<synchronous>, transform_indices = @transform_6, window_bounds = array<i64: 1, 32>}, {pipeline_mode = #tpu.pipeline_mode<synchronous>, transform_indices = @transform_7, window_bounds = array<i64: 32, 32>}, {pipeline_mode = #tpu.pipeline_mode<synchronous>, transform_indices = @transform_8, window_bounds = array<i64: 1, 32>}, {pipeline_mode = #tpu.pipeline_mode<synchronous>, transform_indices = @transform_9, window_bounds = array<i64: 32, 32>}, {pipeline_mode = #tpu.pipeline_mode<synchronous>, transform_indices = @transform_10, window_bounds = array<i64: 1, 32>}, {pipeline_mode = #tpu.pipeline_mode<synchronous>, transform_indices = @transform_11, window_bounds = array<i64: 32, 16>}, {pipeline_mode = #tpu.pipeline_mode<synchronous>, transform_indices = @transform_12, window_bounds = array<i64: 1, 16>}, {transform_indices = @transform_13, window_bounds = array<i64: 1, 8, 16>}, {transform_indices = @transform_14, window_bounds = array<i64: 1, 4, 8, 8>}]} {
    %c0 = arith.constant 0 : index
    %c0_0 = arith.constant 0 : index
    %c0_1 = arith.constant 0 : index
    %0 = vector.load %arg1[%c0, %c0_0, %c0_1] : memref<1x8x32xf32, #tpu.memory_space<vmem>>, vector<1x8x32xf32>
    %1 = vector.shape_cast %0 : vector<1x8x32xf32> to vector<8x32xf32>
    %c0_2 = arith.constant 0 : index
    %c0_3 = arith.constant 0 : index
    %c0_4 = arith.constant 0 : index
    %2 = vector.load %arg2[%c0_2, %c0_3, %c0_4] : memref<1x8x32xf32, #tpu.memory_space<vmem>>, vector<1x8x32xf32>
    %3 = vector.shape_cast %2 : vector<1x8x32xf32> to vector<8x32xf32>
    %c0_5 = arith.constant 0 : index
    %c0_6 = arith.constant 0 : index
    %4 = vector.load %arg4[%c0_5, %c0_6] : memref<32x32xf32, #tpu.memory_space<vmem>>, vector<32x32xf32>
    %cst = arith.constant dense<0.000000e+00> : vector<8x32xf32>
    %5 = tpu.matmul %3, %4, %cst {dimension_numbers = #tpu.dot_dimension_numbers<[1], [0], [0], [1], [0, 0, 1, 1], [], []>} : vector<8x32xf32>, vector<32x32xf32>, vector<8x32xf32> -> vector<8x32xf32>
    %c0_7 = arith.constant 0 : index
    %c0_8 = arith.constant 0 : index
    %6 = vector.load %arg5[%c0_7, %c0_8] : memref<1x32xf32, #tpu.memory_space<vmem>>, vector<1x32xf32>
    %7 = vector.broadcast %6 : vector<1x32xf32> to vector<8x32xf32>
    %8 = arith.addf %5, %7 : vector<8x32xf32>
    %9 = vector.shape_cast %8 : vector<8x32xf32> to vector<1x8x32xf32>
    %c0_9 = arith.constant 0 : index
    %c0_10 = arith.constant 0 : index
    %10 = vector.load %arg6[%c0_9, %c0_10] : memref<32x32xf32, #tpu.memory_space<vmem>>, vector<32x32xf32>
    %cst_11 = arith.constant dense<0.000000e+00> : vector<8x32xf32>
    %11 = tpu.matmul %1, %10, %cst_11 {dimension_numbers = #tpu.dot_dimension_numbers<[1], [0], [0], [1], [0, 0, 1, 1], [], []>} : vector<8x32xf32>, vector<32x32xf32>, vector<8x32xf32> -> vector<8x32xf32>
    %c0_12 = arith.constant 0 : index
    %c0_13 = arith.constant 0 : index
    %12 = vector.load %arg7[%c0_12, %c0_13] : memref<1x32xf32, #tpu.memory_space<vmem>>, vector<1x32xf32>
    %13 = vector.broadcast %12 : vector<1x32xf32> to vector<8x32xf32>
    %14 = arith.addf %11, %13 : vector<8x32xf32>
    %15 = vector.shape_cast %14 : vector<8x32xf32> to vector<1x8x32xf32>
    %c0_14 = arith.constant 0 : index
    %c0_15 = arith.constant 0 : index
    %16 = vector.load %arg8[%c0_14, %c0_15] : memref<32x32xf32, #tpu.memory_space<vmem>>, vector<32x32xf32>
    %cst_16 = arith.constant dense<0.000000e+00> : vector<8x32xf32>
    %17 = tpu.matmul %1, %16, %cst_16 {dimension_numbers = #tpu.dot_dimension_numbers<[1], [0], [0], [1], [0, 0, 1, 1], [], []>} : vector<8x32xf32>, vector<32x32xf32>, vector<8x32xf32> -> vector<8x32xf32>
    %c0_17 = arith.constant 0 : index
    %c0_18 = arith.constant 0 : index
    %18 = vector.load %arg9[%c0_17, %c0_18] : memref<1x32xf32, #tpu.memory_space<vmem>>, vector<1x32xf32>
    %19 = vector.broadcast %18 : vector<1x32xf32> to vector<8x32xf32>
    %20 = arith.addf %17, %19 : vector<8x32xf32>
    %21 = vector.shape_cast %20 : vector<8x32xf32> to vector<1x8x32xf32>
    %c0_19 = arith.constant 0 : index
    %c0_20 = arith.constant 0 : index
    %c0_21 = arith.constant 0 : index
    %22 = vector.load %arg3[%c0_19, %c0_20, %c0_21] : memref<1x1x8xi32, #tpu.memory_space<vmem>>, vector<1x1x8xi32>
    %c0_i32 = arith.constant 0 : i32
    %23 = vector.broadcast %c0_i32 : i32 to vector<1x1x8xi32>
    %24 = arith.cmpi eq, %22, %23 : vector<1x1x8xi32>
    %cst_22 = arith.constant -1.000000e+30 : f32
    %cst_23 = arith.constant 0.000000e+00 : f32
    %25 = vector.broadcast %cst_22 : f32 to vector<1x1x8xf32>
    %26 = vector.broadcast %cst_23 : f32 to vector<1x1x8xf32>
    %27 = arith.select %24, %25, %26 : vector<1x1x8xi1>, vector<1x1x8xf32>
    %28 = vector.shape_cast %27 : vector<1x1x8xf32> to vector<1x1x8xf32>
    %29 = vector.broadcast %28 : vector<1x1x8xf32> to vector<1x8x8xf32>
    %30 = vector.extract_strided_slice %9 {offsets = [0, 0, 0], sizes = [1, 8, 8], strides = [1, 1, 1]} : vector<1x8x32xf32> to vector<1x8x8xf32>
    %31 = vector.extract_strided_slice %15 {offsets = [0, 0, 0], sizes = [1, 8, 8], strides = [1, 1, 1]} : vector<1x8x32xf32> to vector<1x8x8xf32>
    %32 = vector.extract_strided_slice %21 {offsets = [0, 0, 0], sizes = [1, 8, 8], strides = [1, 1, 1]} : vector<1x8x32xf32> to vector<1x8x8xf32>
    "tpu.trace_start"() <{level = 10 : i32, message = "bqd,bkd->bqk"}> : () -> ()
    %cst_24 = arith.constant dense<0.000000e+00> : vector<1x8x8xf32>
    %33 = tpu.matmul %30, %31, %cst_24 {dimension_numbers = #tpu.dot_dimension_numbers<[2], [2], [1], [1], [0, 0, 0, 1, 1, 1], [0], [0]>} : vector<1x8x8xf32>, vector<1x8x8xf32>, vector<1x8x8xf32> -> vector<1x8x8xf32>
    "tpu.trace_stop"() : () -> ()
    %cst_25 = arith.constant 0.353553385 : f32
    %34 = vector.broadcast %cst_25 : f32 to vector<1x8x8xf32>
    %35 = arith.mulf %33, %34 : vector<1x8x8xf32>
    %36 = arith.addf %35, %29 : vector<1x8x8xf32>
    %cst_26 = arith.constant dense<0xFF800000> : vector<1x8xf32>
    %37 = vector.multi_reduction <maximumf>, %36, %cst_26 [2] : vector<1x8x8xf32> to vector<1x8xf32>
    %38 = vector.shape_cast %37 : vector<1x8xf32> to vector<1x8x1xf32>
    %39 = vector.broadcast %38 : vector<1x8x1xf32> to vector<1x8x8xf32>
    %40 = arith.subf %36, %39 : vector<1x8x8xf32>
    %41 = math.exp %40 : vector<1x8x8xf32>
    %cst_27 = arith.constant dense<0.000000e+00> : vector<1x8xf32>
    %42 = vector.multi_reduction <add>, %41, %cst_27 [2] : vector<1x8x8xf32> to vector<1x8xf32>
    %43 = vector.shape_cast %42 : vector<1x8xf32> to vector<1x8x1xf32>
    %44 = tpu.reciprocal %43 {approx = true} : vector<1x8x1xf32> -> vector<1x8x1xf32>
    %45 = vector.broadcast %44 : vector<1x8x1xf32> to vector<1x8x8xf32>
    %46 = arith.mulf %41, %45 : vector<1x8x8xf32>
    %c0_28 = arith.constant 0 : index
    %c0_29 = arith.constant 0 : index
    %c0_30 = arith.constant 0 : index
    %c0_31 = arith.constant 0 : index
    %47 = vector.load %arg15[%c0_28, %c0_29, %c0_30, %c0_31] : memref<1x4x8x8xf32, #tpu.memory_space<vmem>>, vector<1x1x8x8xf32>
    %48 = vector.shape_cast %47 : vector<1x1x8x8xf32> to vector<1x8x8xf32>
    %49 = vector.shape_cast %46 : vector<1x8x8xf32> to vector<1x1x8x8xf32>
    tpu.vector_store %arg15[%c0_28, %c0_29, %c0_30, %c0_31], %49 {strides = array<i32>} : memref<1x4x8x8xf32, #tpu.memory_space<vmem>>, vector<1x1x8x8xf32>,
    "tpu.trace_start"() <{level = 10 : i32, message = "bqk,bkd->bqd"}> : () -> ()
    %cst_32 = arith.constant dense<0.000000e+00> : vector<1x8x8xf32>
    %50 = tpu.matmul %46, %32, %cst_32 {dimension_numbers = #tpu.dot_dimension_numbers<[2], [1], [1], [2], [0, 0, 0, 1, 1, 2], [0], [0]>} : vector<1x8x8xf32>, vector<1x8x8xf32>, vector<1x8x8xf32> -> vector<1x8x8xf32>
    "tpu.trace_stop"() : () -> ()
    %51 = vector.shape_cast %50 : vector<1x8x8xf32> to vector<8x8xf32>
    %c0_33 = arith.constant 0 : index
    %c0_34 = arith.constant 0 : index
    %52 = vector.load %arg16[%c0_33, %c0_34] : memref<8x32xf32, #tpu.memory_space<vmem>>, vector<8x8xf32>
    tpu.vector_store %arg16[%c0_33, %c0_34], %51 {strides = array<i32>} : memref<8x32xf32, #tpu.memory_space<vmem>>, vector<8x8xf32>,
    %53 = vector.extract_strided_slice %9 {offsets = [0, 0, 8], sizes = [1, 8, 8], strides = [1, 1, 1]} : vector<1x8x32xf32> to vector<1x8x8xf32>
    %54 = vector.extract_strided_slice %15 {offsets = [0, 0, 8], sizes = [1, 8, 8], strides = [1, 1, 1]} : vector<1x8x32xf32> to vector<1x8x8xf32>
    %55 = vector.extract_strided_slice %21 {offsets = [0, 0, 8], sizes = [1, 8, 8], strides = [1, 1, 1]} : vector<1x8x32xf32> to vector<1x8x8xf32>
    "tpu.trace_start"() <{level = 10 : i32, message = "bqd,bkd->bqk"}> : () -> ()
    %cst_35 = arith.constant dense<0.000000e+00> : vector<1x8x8xf32>
    %56 = tpu.matmul %53, %54, %cst_35 {dimension_numbers = #tpu.dot_dimension_numbers<[2], [2], [1], [1], [0, 0, 0, 1, 1, 1], [0], [0]>} : vector<1x8x8xf32>, vector<1x8x8xf32>, vector<1x8x8xf32> -> vector<1x8x8xf32>
    "tpu.trace_stop"() : () -> ()
    %cst_36 = arith.constant 0.353553385 : f32
    %57 = vector.broadcast %cst_36 : f32 to vector<1x8x8xf32>
    %58 = arith.mulf %56, %57 : vector<1x8x8xf32>
    %59 = arith.addf %58, %29 : vector<1x8x8xf32>
    %cst_37 = arith.constant dense<0xFF800000> : vector<1x8xf32>
    %60 = vector.multi_reduction <maximumf>, %59, %cst_37 [2] : vector<1x8x8xf32> to vector<1x8xf32>
    %61 = vector.shape_cast %60 : vector<1x8xf32> to vector<1x8x1xf32>
    %62 = vector.broadcast %61 : vector<1x8x1xf32> to vector<1x8x8xf32>
    %63 = arith.subf %59, %62 : vector<1x8x8xf32>
    %64 = math.exp %63 : vector<1x8x8xf32>
    %cst_38 = arith.constant dense<0.000000e+00> : vector<1x8xf32>
    %65 = vector.multi_reduction <add>, %64, %cst_38 [2] : vector<1x8x8xf32> to vector<1x8xf32>
    %66 = vector.shape_cast %65 : vector<1x8xf32> to vector<1x8x1xf32>
    %67 = tpu.reciprocal %66 {approx = true} : vector<1x8x1xf32> -> vector<1x8x1xf32>
    %68 = vector.broadcast %67 : vector<1x8x1xf32> to vector<1x8x8xf32>
    %69 = arith.mulf %64, %68 : vector<1x8x8xf32>
    %c0_39 = arith.constant 0 : index
    %c1 = arith.constant 1 : index
    %c0_40 = arith.constant 0 : index
    %c0_41 = arith.constant 0 : index
    %70 = vector.load %arg15[%c0_39, %c1, %c0_40, %c0_41] : memref<1x4x8x8xf32, #tpu.memory_space<vmem>>, vector<1x1x8x8xf32>
    %71 = vector.shape_cast %70 : vector<1x1x8x8xf32> to vector<1x8x8xf32>
    %72 = vector.shape_cast %69 : vector<1x8x8xf32> to vector<1x1x8x8xf32>
    tpu.vector_store %arg15[%c0_39, %c1, %c0_40, %c0_41], %72 {strides = array<i32>} : memref<1x4x8x8xf32, #tpu.memory_space<vmem>>, vector<1x1x8x8xf32>,
    "tpu.trace_start"() <{level = 10 : i32, message = "bqk,bkd->bqd"}> : () -> ()
    %cst_42 = arith.constant dense<0.000000e+00> : vector<1x8x8xf32>
    %73 = tpu.matmul %69, %55, %cst_42 {dimension_numbers = #tpu.dot_dimension_numbers<[2], [1], [1], [2], [0, 0, 0, 1, 1, 2], [0], [0]>} : vector<1x8x8xf32>, vector<1x8x8xf32>, vector<1x8x8xf32> -> vector<1x8x8xf32>
    "tpu.trace_stop"() : () -> ()
    %74 = vector.shape_cast %73 : vector<1x8x8xf32> to vector<8x8xf32>
    %c0_43 = arith.constant 0 : index
    %c8 = arith.constant 8 : index
    %75 = vector.load %arg16[%c0_43, %c8] : memref<8x32xf32, #tpu.memory_space<vmem>>, vector<8x8xf32>
    tpu.vector_store %arg16[%c0_43, %c8], %74 {strides = array<i32>} : memref<8x32xf32, #tpu.memory_space<vmem>>, vector<8x8xf32>,
    %76 = vector.extract_strided_slice %9 {offsets = [0, 0, 16], sizes = [1, 8, 8], strides = [1, 1, 1]} : vector<1x8x32xf32> to vector<1x8x8xf32>
    %77 = vector.extract_strided_slice %15 {offsets = [0, 0, 16], sizes = [1, 8, 8], strides = [1, 1, 1]} : vector<1x8x32xf32> to vector<1x8x8xf32>
    %78 = vector.extract_strided_slice %21 {offsets = [0, 0, 16], sizes = [1, 8, 8], strides = [1, 1, 1]} : vector<1x8x32xf32> to vector<1x8x8xf32>
    "tpu.trace_start"() <{level = 10 : i32, message = "bqd,bkd->bqk"}> : () -> ()
    %cst_44 = arith.constant dense<0.000000e+00> : vector<1x8x8xf32>
    %79 = tpu.matmul %76, %77, %cst_44 {dimension_numbers = #tpu.dot_dimension_numbers<[2], [2], [1], [1], [0, 0, 0, 1, 1, 1], [0], [0]>} : vector<1x8x8xf32>, vector<1x8x8xf32>, vector<1x8x8xf32> -> vector<1x8x8xf32>
    "tpu.trace_stop"() : () -> ()
    %cst_45 = arith.constant 0.353553385 : f32
    %80 = vector.broadcast %cst_45 : f32 to vector<1x8x8xf32>
    %81 = arith.mulf %79, %80 : vector<1x8x8xf32>
    %82 = arith.addf %81, %29 : vector<1x8x8xf32>
    %cst_46 = arith.constant dense<0xFF800000> : vector<1x8xf32>
    %83 = vector.multi_reduction <maximumf>, %82, %cst_46 [2] : vector<1x8x8xf32> to vector<1x8xf32>
    %84 = vector.shape_cast %83 : vector<1x8xf32> to vector<1x8x1xf32>
    %85 = vector.broadcast %84 : vector<1x8x1xf32> to vector<1x8x8xf32>
    %86 = arith.subf %82, %85 : vector<1x8x8xf32>
    %87 = math.exp %86 : vector<1x8x8xf32>
    %cst_47 = arith.constant dense<0.000000e+00> : vector<1x8xf32>
    %88 = vector.multi_reduction <add>, %87, %cst_47 [2] : vector<1x8x8xf32> to vector<1x8xf32>
    %89 = vector.shape_cast %88 : vector<1x8xf32> to vector<1x8x1xf32>
    %90 = tpu.reciprocal %89 {approx = true} : vector<1x8x1xf32> -> vector<1x8x1xf32>
    %91 = vector.broadcast %90 : vector<1x8x1xf32> to vector<1x8x8xf32>
    %92 = arith.mulf %87, %91 : vector<1x8x8xf32>
    %c0_48 = arith.constant 0 : index
    %c2 = arith.constant 2 : index
    %c0_49 = arith.constant 0 : index
    %c0_50 = arith.constant 0 : index
    %93 = vector.load %arg15[%c0_48, %c2, %c0_49, %c0_50] : memref<1x4x8x8xf32, #tpu.memory_space<vmem>>, vector<1x1x8x8xf32>
    %94 = vector.shape_cast %93 : vector<1x1x8x8xf32> to vector<1x8x8xf32>
    %95 = vector.shape_cast %92 : vector<1x8x8xf32> to vector<1x1x8x8xf32>
    tpu.vector_store %arg15[%c0_48, %c2, %c0_49, %c0_50], %95 {strides = array<i32>} : memref<1x4x8x8xf32, #tpu.memory_space<vmem>>, vector<1x1x8x8xf32>,
    "tpu.trace_start"() <{level = 10 : i32, message = "bqk,bkd->bqd"}> : () -> ()
    %cst_51 = arith.constant dense<0.000000e+00> : vector<1x8x8xf32>
    %96 = tpu.matmul %92, %78, %cst_51 {dimension_numbers = #tpu.dot_dimension_numbers<[2], [1], [1], [2], [0, 0, 0, 1, 1, 2], [0], [0]>} : vector<1x8x8xf32>, vector<1x8x8xf32>, vector<1x8x8xf32> -> vector<1x8x8xf32>
    "tpu.trace_stop"() : () -> ()
    %97 = vector.shape_cast %96 : vector<1x8x8xf32> to vector<8x8xf32>
    %c0_52 = arith.constant 0 : index
    %c16 = arith.constant 16 : index
    %98 = vector.load %arg16[%c0_52, %c16] : memref<8x32xf32, #tpu.memory_space<vmem>>, vector<8x8xf32>
    tpu.vector_store %arg16[%c0_52, %c16], %97 {strides = array<i32>} : memref<8x32xf32, #tpu.memory_space<vmem>>, vector<8x8xf32>,
    %99 = vector.extract_strided_slice %9 {offsets = [0, 0, 24], sizes = [1, 8, 8], strides = [1, 1, 1]} : vector<1x8x32xf32> to vector<1x8x8xf32>
    %100 = vector.extract_strided_slice %15 {offsets = [0, 0, 24], sizes = [1, 8, 8], strides = [1, 1, 1]} : vector<1x8x32xf32> to vector<1x8x8xf32>
    %101 = vector.extract_strided_slice %21 {offsets = [0, 0, 24], sizes = [1, 8, 8], strides = [1, 1, 1]} : vector<1x8x32xf32> to vector<1x8x8xf32>
    "tpu.trace_start"() <{level = 10 : i32, message = "bqd,bkd->bqk"}> : () -> ()
    %cst_53 = arith.constant dense<0.000000e+00> : vector<1x8x8xf32>
    %102 = tpu.matmul %99, %100, %cst_53 {dimension_numbers = #tpu.dot_dimension_numbers<[2], [2], [1], [1], [0, 0, 0, 1, 1, 1], [0], [0]>} : vector<1x8x8xf32>, vector<1x8x8xf32>, vector<1x8x8xf32> -> vector<1x8x8xf32>
    "tpu.trace_stop"() : () -> ()
    %cst_54 = arith.constant 0.353553385 : f32
    %103 = vector.broadcast %cst_54 : f32 to vector<1x8x8xf32>
    %104 = arith.mulf %102, %103 : vector<1x8x8xf32>
    %105 = arith.addf %104, %29 : vector<1x8x8xf32>
    %cst_55 = arith.constant dense<0xFF800000> : vector<1x8xf32>
    %106 = vector.multi_reduction <maximumf>, %105, %cst_55 [2] : vector<1x8x8xf32> to vector<1x8xf32>
    %107 = vector.shape_cast %106 : vector<1x8xf32> to vector<1x8x1xf32>
    %108 = vector.broadcast %107 : vector<1x8x1xf32> to vector<1x8x8xf32>
    %109 = arith.subf %105, %108 : vector<1x8x8xf32>
    %110 = math.exp %109 : vector<1x8x8xf32>
    %cst_56 = arith.constant dense<0.000000e+00> : vector<1x8xf32>
    %111 = vector.multi_reduction <add>, %110, %cst_56 [2] : vector<1x8x8xf32> to vector<1x8xf32>
    %112 = vector.shape_cast %111 : vector<1x8xf32> to vector<1x8x1xf32>
    %113 = tpu.reciprocal %112 {approx = true} : vector<1x8x1xf32> -> vector<1x8x1xf32>
    %114 = vector.broadcast %113 : vector<1x8x1xf32> to vector<1x8x8xf32>
    %115 = arith.mulf %110, %114 : vector<1x8x8xf32>
    %c0_57 = arith.constant 0 : index
    %c3 = arith.constant 3 : index
    %c0_58 = arith.constant 0 : index
    %c0_59 = arith.constant 0 : index
    %116 = vector.load %arg15[%c0_57, %c3, %c0_58, %c0_59] : memref<1x4x8x8xf32, #tpu.memory_space<vmem>>, vector<1x1x8x8xf32>
    %117 = vector.shape_cast %116 : vector<1x1x8x8xf32> to vector<1x8x8xf32>
    %118 = vector.shape_cast %115 : vector<1x8x8xf32> to vector<1x1x8x8xf32>
    tpu.vector_store %arg15[%c0_57, %c3, %c0_58, %c0_59], %118 {strides = array<i32>} : memref<1x4x8x8xf32, #tpu.memory_space<vmem>>, vector<1x1x8x8xf32>,
    "tpu.trace_start"() <{level = 10 : i32, message = "bqk,bkd->bqd"}> : () -> ()
    %cst_60 = arith.constant dense<0.000000e+00> : vector<1x8x8xf32>
    %119 = tpu.matmul %115, %101, %cst_60 {dimension_numbers = #tpu.dot_dimension_numbers<[2], [1], [1], [2], [0, 0, 0, 1, 1, 2], [0], [0]>} : vector<1x8x8xf32>, vector<1x8x8xf32>, vector<1x8x8xf32> -> vector<1x8x8xf32>
    "tpu.trace_stop"() : () -> ()
    %120 = vector.shape_cast %119 : vector<1x8x8xf32> to vector<8x8xf32>
    %c0_61 = arith.constant 0 : index
    %c24 = arith.constant 24 : index
    %121 = vector.load %arg16[%c0_61, %c24] : memref<8x32xf32, #tpu.memory_space<vmem>>, vector<8x8xf32>
    tpu.vector_store %arg16[%c0_61, %c24], %120 {strides = array<i32>} : memref<8x32xf32, #tpu.memory_space<vmem>>, vector<8x8xf32>,
    %c0_62 = arith.constant 0 : index
    %c0_63 = arith.constant 0 : index
    %122 = vector.load %arg16[%c0_62, %c0_63] : memref<8x32xf32, #tpu.memory_space<vmem>>, vector<8x32xf32>
    %c0_64 = arith.constant 0 : index
    %c0_65 = arith.constant 0 : index
    %123 = vector.load %arg10[%c0_64, %c0_65] : memref<32x32xf32, #tpu.memory_space<vmem>>, vector<32x32xf32>
    %cst_66 = arith.constant dense<0.000000e+00> : vector<8x32xf32>
    %124 = tpu.matmul %122, %123, %cst_66 {dimension_numbers = #tpu.dot_dimension_numbers<[1], [0], [0], [1], [0, 0, 1, 1], [], []>} : vector<8x32xf32>, vector<32x32xf32>, vector<8x32xf32> -> vector<8x32xf32>
    %c0_67 = arith.constant 0 : index
    %c0_68 = arith.constant 0 : index
    %125 = vector.load %arg11[%c0_67, %c0_68] : memref<1x32xf32, #tpu.memory_space<vmem>>, vector<1x32xf32>
    %126 = vector.broadcast %125 : vector<1x32xf32> to vector<8x32xf32>
    %127 = arith.addf %124, %126 : vector<8x32xf32>
    %c0_69 = arith.constant 0 : index
    %c0_70 = arith.constant 0 : index
    %128 = vector.load %arg12[%c0_69, %c0_70] : memref<32x16xf32, #tpu.memory_space<vmem>>, vector<32x16xf32>
    %cst_71 = arith.constant dense<0.000000e+00> : vector<8x16xf32>
    %129 = tpu.matmul %127, %128, %cst_71 {dimension_numbers = #tpu.dot_dimension_numbers<[1], [0], [0], [1], [0, 0, 1, 1], [], []>} : vector<8x32xf32>, vector<32x16xf32>, vector<8x16xf32> -> vector<8x16xf32>
    %c0_72 = arith.constant 0 : index
    %c0_73 = arith.constant 0 : index
    %130 = vector.load %arg13[%c0_72, %c0_73] : memref<1x16xf32, #tpu.memory_space<vmem>>, vector<1x16xf32>
    %131 = vector.broadcast %130 : vector<1x16xf32> to vector<8x16xf32>
    %132 = arith.addf %129, %131 : vector<8x16xf32>
    %133 = vector.shape_cast %132 : vector<8x16xf32> to vector<1x8x16xf32>
    %c0_74 = arith.constant 0 : index
    %c0_75 = arith.constant 0 : index
    %c0_76 = arith.constant 0 : index
    %134 = vector.load %arg14[%c0_74, %c0_75, %c0_76] : memref<1x8x16xf32, #tpu.memory_space<vmem>>, vector<1x8x16xf32>
    tpu.vector_store %arg14[%c0_74, %c0_75, %c0_76], %133 {strides = array<i32>} : memref<1x8x16xf32, #tpu.memory_space<vmem>>, vector<1x8x16xf32>,
    return
  }
  func.func @transform_0(%arg0: i32) -> (i32, i32, i32) {
    %c0_i32 = arith.constant 0 : i32
    %c0_i32_0 = arith.constant 0 : i32
    %c0_i32_1 = arith.constant 0 : i32
    return %arg0, %c0_i32, %c0_i32_0 : i32, i32, i32
  }
  func.func @transform_1(%arg0: i32) -> (i32, i32, i32) {
    %c0_i32 = arith.constant 0 : i32
    %c0_i32_0 = arith.constant 0 : i32
    %c0_i32_1 = arith.constant 0 : i32
    return %arg0, %c0_i32, %c0_i32_0 : i32, i32, i32
  }
  func.func @transform_2(%arg0: i32) -> (i32, i32, i32) {
    %c0_i32 = arith.constant 0 : i32
    %c0_i32_0 = arith.constant 0 : i32
    %c0_i32_1 = arith.constant 0 : i32
    return %arg0, %c0_i32, %c0_i32_0 : i32, i32, i32
  }
  func.func @transform_3(%arg0: i32) -> (i32, i32) {
    %c0_i32 = arith.constant 0 : i32
    %c0_i32_0 = arith.constant 0 : i32
    %c0_i32_1 = arith.constant 0 : i32
    return %c0_i32, %c0_i32_0 : i32, i32
  }
  func.func @transform_4(%arg0: i32) -> (i32, i32) {
    %c0_i32 = arith.constant 0 : i32
    %c0_i32_0 = arith.constant 0 : i32
    %c0_i32_1 = arith.constant 0 : i32
    return %c0_i32, %c0_i32_0 : i32, i32
  }
  func.func @transform_5(%arg0: i32) -> (i32, i32) {
    %c0_i32 = arith.constant 0 : i32
    %c0_i32_0 = arith.constant 0 : i32
    %c0_i32_1 = arith.constant 0 : i32
    return %c0_i32, %c0_i32_0 : i32, i32
  }
  func.func @transform_6(%arg0: i32) -> (i32, i32) {
    %c0_i32 = arith.constant 0 : i32
    %c0_i32_0 = arith.constant 0 : i32
    %c0_i32_1 = arith.constant 0 : i32
    return %c0_i32, %c0_i32_0 : i32, i32
  }
  func.func @transform_7(%arg0: i32) -> (i32, i32) {
    %c0_i32 = arith.constant 0 : i32
    %c0_i32_0 = arith.constant 0 : i32
    %c0_i32_1 = arith.constant 0 : i32
    return %c0_i32, %c0_i32_0 : i32, i32
  }
  func.func @transform_8(%arg0: i32) -> (i32, i32) {
    %c0_i32 = arith.constant 0 : i32
    %c0_i32_0 = arith.constant 0 : i32
    %c0_i32_1 = arith.constant 0 : i32
    return %c0_i32, %c0_i32_0 : i32, i32
  }
  func.func @transform_9(%arg0: i32) -> (i32, i32) {
    %c0_i32 = arith.constant 0 : i32
    %c0_i32_0 = arith.constant 0 : i32
    %c0_i32_1 = arith.constant 0 : i32
    return %c0_i32, %c0_i32_0 : i32, i32
  }
  func.func @transform_10(%arg0: i32) -> (i32, i32) {
    %c0_i32 = arith.constant 0 : i32
    %c0_i32_0 = arith.constant 0 : i32
    %c0_i32_1 = arith.constant 0 : i32
    return %c0_i32, %c0_i32_0 : i32, i32
  }
  func.func @transform_11(%arg0: i32) -> (i32, i32) {
    %c0_i32 = arith.constant 0 : i32
    %c0_i32_0 = arith.constant 0 : i32
    %c0_i32_1 = arith.constant 0 : i32
    return %c0_i32, %c0_i32_0 : i32, i32
  }
  func.func @transform_12(%arg0: i32) -> (i32, i32) {
    %c0_i32 = arith.constant 0 : i32
    %c0_i32_0 = arith.constant 0 : i32
    %c0_i32_1 = arith.constant 0 : i32
    return %c0_i32, %c0_i32_0 : i32, i32
  }
  func.func @transform_13(%arg0: i32) -> (i32, i32, i32) {
    %c0_i32 = arith.constant 0 : i32
    %c0_i32_0 = arith.constant 0 : i32
    %c0_i32_1 = arith.constant 0 : i32
    return %arg0, %c0_i32, %c0_i32_0 : i32, i32, i32
  }
  func.func @transform_14(%arg0: i32) -> (i32, i32, i32, i32) {
    %c0_i32 = arith.constant 0 : i32
    %c0_i32_0 = arith.constant 0 : i32
    %c0_i32_1 = arith.constant 0 : i32
    %c0_i32_2 = arith.constant 0 : i32
    return %arg0, %c0_i32, %c0_i32_0, %c0_i32_1 : i32, i32, i32, i32
  }
}

</mosaic_0001>

<bundles_post_ra>
// kernel: tpu_custom_call.1
= control target key start
LH: loop header
LB: loop body
LE: loop exit
PB: predicated region body
PF: predicated region fallthrough
CT: control target
= control target key end

     0   :  { %s3199_s0 = inlined_call_operand.hbm [shape: f32[2,8,32], index: 0, kind: input, shape index: {}]   ;;  %s3200_s1 = inlined_call_operand.hbm [shape: f32[2,8,32], index: 1, kind: input, shape index: {}]   ;;  %s3201_s2 = inlined_call_operand.hbm [shape: s32[2,1,8], index: 2, kind: input, shape index: {}]   ;;  %s3202_s3 = inlined_call_operand.vmem [shape: f32[32,32], index: 3, kind: input, shape index: {}]   ;;  %s3203_s4 = inlined_call_operand.hbm [shape: f32[1,32], index: 4, kind: input, shape index: {}]   ;;  %s3204_s5 = inlined_call_operand.hbm [shape: f32[32,32], index: 5, kind: input, shape index: {}]   ;;  %s3205_s6 = inlined_call_operand.hbm [shape: f32[1,32], index: 6, kind: input, shape index: {}]   ;;  %s3206_s7 = inlined_call_operand.hbm [shape: f32[32,32], index: 7, kind: input, shape index: {}]   ;;  %s3207_s8 = inlined_call_operand.hbm [shape: f32[1,32], index: 8, kind: input, shape index: {}]   ;;  %s3208_s9 = inlined_call_operand.vmem [shape: f32[32,32], index: 9, kind: input, shape index: {}]   ;;  %s3209_s10 = inlined_call_operand.vmem [shape: f32[1,32], index: 10, kind: input, shape index: {}]   ;;  %s3210_s11 = inlined_call_operand.vmem [shape: f32[32,16], index: 11, kind: input, shape index: {}]   ;;  %s3211_s12 = inlined_call_operand.vmem [shape: f32[1,16], index: 12, kind: input, shape index: {}]   ;;  %s3212_s13 = inlined_call_operand.hbm [shape: f32[2,8,16], index: 13, kind: output, shape index: {0}]   ;;  %s3213_s14 = inlined_call_operand.hbm [shape: f32[2,4,8,8], index: 14, kind: output, shape index: {1}]  }
   0x1   :  { %3235 = sst [smem:[#allocation33_spill]] %s3199_s0 }
   0x2   :  { %3236 = sst [smem:[#allocation34_spill]] %s3200_s1 }
   0x3   :  { %3237 = sst [smem:[#allocation35_spill]] %s3203_s4 }
   0x4   :  { %3238 = sst [smem:[#allocation36_spill]] %s3205_s6 }
   0x5   :  { %3239 = sst [smem:[#allocation37_spill]] %s3209_s10 }
   0x6   :  { %3240 = sst [smem:[#allocation38_spill]] %s3211_s12 }
   0x7   :  { %3241 = sst [smem:[#allocation39_spill]] %s3212_s13 }
   0x8   :  { %3242 = sst [smem:[#allocation40_spill]] %s3213_s14 }
   0x9   :  { %20 = vsyncpa [#allocation4], 0 }
   0xa   :  { %22 = vsyncpa [#allocation4 + $0x1], 0 }
   0xb   :  { %23 = vsyncpa [#allocation7], 0 }
   0xc   :  { %25 = vsyncpa [#allocation7 + $0x1], 0 }
   0xd   :  { %26 = vsyncpa [#allocation10], 0 }
   0xe   :  { %27 = vsyncpa [#allocation13], 0 }
   0xf   :  { %28 = vsyncpa [#allocation16], 0 }
  0x10   :  { %29 = vsyncpa [#allocation5], 0 }
  0x11   :  { %31 = vsyncpa [#allocation5 + $0x1], 0 }
  0x12   :  { %32 = vsyncpa [#allocation19], 0 }
  0x13   :  { %34 = vsyncpa [#allocation19 + $0x1], 0  ;;  %s2730_s29 = smov 0   ;;  %s2732_s30 = smov 0  }
  0x14   :  { %s2734_s15 = smov 0   ;;  %s2736_s16 = smov 0  }
  0x15 LB: > { %3243 = sst [smem:[#allocation27_spill]] %s2620_s29  ;;  %s2634_s17 = smov [#allocation9]   ;;  %s2632_s16 = sphi %s2736_s16, %s3285_s16   ;;  %s2628_s15 = sphi %s2734_s15, %s3287_s15   ;;  %s2624_s30 = sphi %s2732_s30, %s3289_s30   ;;  %s2620_s29 = sphi %s2730_s29, %s3288_s29  }
  0x16   : > { %3244 = sst [smem:[#allocation28_spill]] %s2628_s15  ;;  %s401_s18 = sshll.u32 %s2634_s17, 4  ;;  %s402_s18 = int_to_ptr.vmem [resolvable:$true] %s401_s18 }
  0x17   : > { %s2751_s19 = sadd.s32 4294967295, %s2632_s16   ;;  %p1978_p0 = scmp.ge.s32.totalorder %s2632_s16, 1 }
  0x18   : > { %p3214_p1 = scmp.eq.s32.totalorder %s2751_s19, 0  ;;  %p385_p2 = scmp.lt.s32.totalorder %s2632_s16, 3 }
  0x19   : > { %s2635_s21 = smov [#allocation12]   ;;  %s2319_s25 = scalar_lea.vmem %s402_s18, 16 }
  0x1a   : > { %p2756_p3 = pnand %p1978_p0, %p385_p2  ;;  %s425_s22 = sshll.u32 %s2635_s21, 4  ;;  %s426_s22 = int_to_ptr.vmem [resolvable:$true] %s425_s22 }
  0x1b   : > { %p2320_p8 = scmp.ne.s32.totalorder %s402_s18, %s2319_s25  ;;  %s2326_s26 = scalar_lea.vmem %s402_s18, 32 }
  0x1c   : > { %s3245_s20 = scalar_select %p2756_p3, 1, 0 }
  0x1d   : > { %p2199_p5 = pneg %p2756_p3  ;;  %p2327_p11 = scmp.lt.s32.totalorder %s402_s18, %s402_s18 }
  0x1e   : > { %p2328_p12 = scmp.lt.s32.totalorder %s2326_s26, %s2319_s25 }
  0x1f   : > { %p2765_p6 = pnand %p2199_p5, %p3214_p1 }
  0x20   : > { %p2329_p13 = por %p2328_p12, %p2327_p11 }
  0x21   : > { %s3246_s23 = scalar_select %p2765_p6, 1, 0 }
  0x22   : > { %p2771_p7 = pneg %p2765_p6 }
  0x24   : > { %s3247_s24 = scalar_select %p2771_p7, 1, 0 }
  0x25   : > { %p2322_p9 = pnand %p2320_p8, %p2771_p7 }
  0x27   : > { %p2323_p10 = pneg %p2322_p9 }
  0x29   : > { %p2330_p0 = pnand %p2329_p13, %p2323_p10 }
  0x2b   : > { %2333 = shalt.err (!%p2330_p0)
}
  0x2c   : > { %s3248_s4 = sld [smem:[#allocation35_spill]]  ;;  %s2345_s17 = scalar_lea.vmem %s426_s22, 16 }
  0x2d   : > { %p2346_p2 = scmp.ne.s32.totalorder %s426_s22, %s2345_s17  ;;  %s2352_s21 = scalar_lea.vmem %s426_s22, 32 }
  0x2e   : > { %p2353_p8 = scmp.lt.s32.totalorder %s426_s22, %s426_s22  ;;  %p2354_p9 = scmp.lt.s32.totalorder %s2352_s21, %s2345_s17 }
  0x2f   : > { %p2348_p5 = pnand %p2346_p2, %p2771_p7 }
  0x30   : > { %p2355_p1 = por %p2354_p9, %p2353_p8 }
  0x31   : > { %p2349_p4 = pneg %p2348_p5 }
  0x32   : > { %2202 = dma.hbm_to_vmem [thread:$0]  (!%p2765_p6), %s3248_s4, 16, %s402_s18, [#allocation10]  }
  0x33   : > { %p2356_p3 = pnand %p2355_p1, %p2349_p4 }
  0x35   : > { %2359 = shalt.err (!%p2356_p3)
}
  0x36   : > { %s3249_s6 = sld [smem:[#allocation36_spill]]  ;;  %s1977_s18 = sadd.s32 4294967294, %s2632_s16  }
  0x37   : > { %s2791_s27 = sadd.s32 1, %s2632_s16   ;;  %s47_s17 = sadd.s32 1, %s2628_s15 }
  0x38   : > { %3250 = sst [smem:[#allocation29_spill]] %s2791_s27  ;;  %s44_s28 = ssub.s32 %s2632_s16, %s2791_s27 }
  0x39   : > { %p45_p1 = scmp.eq.s32.totalorder %s44_s28, 0  ;;  %p54_p3 = scmp.ne.s32.totalorder %s2628_s15, %s2624_s30 }
  0x3a   : > { %p55_p4 = scmp.eq.s32.totalorder %s2632_s16, 0  ;;  %p60_p10 = scmp.ne.s32.totalorder %s2624_s30, %s2620_s29 }
  0x3b   : > { %s2802_s21 = scalar_select %p45_p1, %s2628_s15, %s47_s17  }
  0x3c   : > { %2208 = dma.hbm_to_vmem [thread:$0]  (!%p2765_p6), %s3249_s6, 16, %s426_s22, [#allocation13]  }
  0x3d   : > { %3251 = sst [smem:[#allocation30_spill]] %s2802_s21  ;;  %p56_p11 = por %p55_p4, %p54_p3 }
  0x3e   : > { %p3252_p12 = scmp.eq.s32.totalorder %s2751_s19, 0  ;;  %p346_p0 = scmp.eq.s32.totalorder %s2751_s19, 1 }
  0x3f   : > { %p352_p2 = scmp.eq.s32.totalorder %s1977_s18, 1  ;;  %p2237_p5 = scmp.lt.s32.totalorder %s2632_s16, 2 }
  0x40   : > { %p2806_p13 = por %p3252_p12, %p60_p10  ;;  %s2813_s22 = sand.u32 1, %s2628_s15  }
  0x41   : > { %p2815_p8 = por %p346_p0, %p54_p3  ;;  %p2819_p9 = por %p352_p2, %p60_p10 }
  0x42   : > { %s3253_s25 = scalar_select %p2806_p13, 1, 0 }
  0x43   : > { %s3254_s26 = scalar_select %p2815_p8, 1, 0 }
  0x44   : > { %s3256_s28 = scalar_select %p2819_p9, 1, 0 }
  0x45   : > { %3255 = sst [smem:[#allocation31_spill]] %s3254_s26  ;;  %s3225_s17 = sshll.u32 %s2813_s22, 3 }
  0x46   : > { %3257 = sst [smem:[#allocation32_spill]] %s3256_s28  ;;  %s3226_s4 = sshll.u32 %s2632_s16, 7 }
  0x47   : > { %p2825_p1 = pnand %p2237_p5, %p56_p11  ;;  %s490_s18 = sand.u32 1, %s2632_s16  }
  0x48   : > { %s3259_s1 = sld [smem:[#allocation34_spill]]  ;;  %s494_s29 = scalar_lea.vmem [#allocation6], %s3225_s17 }
  0x49   : > { %s501_s28 = sshll.u32 %s494_s29, 4  ;;  %s2636_s13 = smov [#allocation11]   ;;  %s2839_s28 = int_to_ptr.vmem [resolvable:$true] %s501_s28 }
  0x4a   : > { %s411_s12 = sshll.u32 %s2636_s13, 4  ;;  %s2841_s14 = scalar_lea.sflag [#allocation7], %s490_s18  ;;  %s412_s12 = int_to_ptr.vmem [resolvable:$true] %s411_s12 }
  0x4b   : > { %p2847_p4 = pneg %p2825_p1 }
  0x4d   : > { %s3260_s26 = scalar_select %p2847_p4, 1, 0 }
  0x4e   : > { %s2835_s27 = scalar_lea.hbm %s3259_s1, %s3226_s4  ;;  %s2365_s29 = scalar_lea.hbm %s3259_s1, 256 }
  0x4f   : > { %s2360_s10 = scalar_lea.hbm %s2835_s27, 128  ;;  %p2366_p12 = scmp.lt.s32.totalorder %s2835_s27, %s3259_s1 }
  0x50   : > { %p2361_p3 = scmp.ne.s32.totalorder %s2835_s27, %s2360_s10  ;;  %p2367_p0 = scmp.lt.s32.totalorder %s2365_s29, %s2360_s10 }
  0x52   : > { %p2363_p10 = pnand %p2847_p4, %p2361_p3  ;;  %p2368_p2 = por %p2367_p0, %p2366_p12 }
  0x54   : > { %p2364_p11 = pneg %p2363_p10 }
  0x56   : > { %p2369_p5 = pnand %p2368_p2, %p2364_p11 }
  0x58   : > { %2372 = shalt.err (!%p2369_p5)
}
  0x59   : > { %s2373_s13 = scalar_lea.vmem %s2839_s28, 128  ;;  %s2637_s18 = smov [#allocation6]  }
  0x5a   : > { %p2374_p9 = scmp.ne.s32.totalorder %s2839_s28, %s2373_s13  ;;  %s2378_s15 = sshll.u32 %s2637_s18, 4  ;;  %s2379_s15 = int_to_ptr.vmem [resolvable:$false] %s2378_s15 }
  0x5b   : > { %s2380_s21 = scalar_lea.vmem %s2379_s15, 256  ;;  %p2381_p8 = scmp.lt.s32.totalorder %s2839_s28, %s2379_s15 }
  0x5c   : > { %p2376_p3 = pnand %p2374_p9, %p2847_p4  ;;  %p2382_p13 = scmp.lt.s32.totalorder %s2380_s21, %s2373_s13 }
  0x5e   : > { %p2377_p10 = pneg %p2376_p3  ;;  %p2383_p6 = por %p2382_p13, %p2381_p8 }
  0x60   : > { %p2384_p7 = pnand %p2383_p6, %p2377_p10 }
  0x62   : > { %2387 = shalt.err (!%p2384_p7)
}
  0x63   : > { %2221 = dma.hbm_to_vmem [thread:$0]  (!%p2825_p1), %s2835_s27, 128, %s2839_s28, %s2841_s14  }
  0x64   : > { %s2399_s4 = scalar_lea.vmem %s412_s12, 512  ;;  %p3261_p11 = scmp.ne.s32.totalorder %s3247_s24, 0 }
  0x65   : > { %p2400_p9 = scmp.ne.s32.totalorder %s412_s12, %s2399_s4  ;;  %p2407_p2 = scmp.lt.s32.totalorder %s412_s12, %s412_s12 }
  0x66   : > { %p2408_p5 = scmp.lt.s32.totalorder %s2399_s4, %s2399_s4 }
  0x67   : > { %p2402_p12 = pnand %p2400_p9, %p3261_p11 }
  0x68   : > { %p2409_p3 = por %p2408_p5, %p2407_p2 }
  0x69   : > { %p2403_p0 = pneg %p2402_p12 }
  0x6b   : > { %p2410_p4 = pnand %p2409_p3, %p2403_p0 }
  0x6d   : > { %2413 = shalt.err (!%p2410_p4)
}
  0x6e   : > { %s2638_s10 = smov 128   ;;  %s2639_s17 = smov 8  }
  0x6f   : > { %p3262_p6 = scmp.ne.s32.totalorder %s3246_s23, 0  ;;  %s2640_s27 = smov [#allocation14]  }
  0x70   : > { %s435_s28 = sshll.u32 %s2640_s27, 4  ;;  %s2641_s18 = smov [#allocation15]   ;;  %s436_s28 = int_to_ptr.vmem [resolvable:$true] %s435_s28 }
  0x71   : > { %2205 = dma.hbm_to_vmem [thread:$0]  (!%p3262_p6), %s3204_s5, 512, %s412_s12, [#allocation10], %s2638_s10, %s2638_s10, %s2639_s17  }
  0x72   : > { %s449_s15 = sshll.u32 %s2641_s18, 4  ;;  %s2425_s21 = scalar_lea.vmem %s436_s28, 512  ;;  %s450_s15 = int_to_ptr.vmem [resolvable:$true] %s449_s15 }
  0x73   : > { %p2426_p7 = scmp.ne.s32.totalorder %s436_s28, %s2425_s21  ;;  %p2433_p4 = scmp.lt.s32.totalorder %s436_s28, %s436_s28 }
  0x74   : > { %p2434_p10 = scmp.lt.s32.totalorder %s2425_s21, %s2425_s21 }
  0x75   : > { %p2428_p13 = pnand %p2426_p7, %p3261_p11 }
  0x76   : > { %p2435_p9 = por %p2434_p10, %p2433_p4 }
  0x77   : > { %p2429_p8 = pneg %p2428_p13 }
  0x79   : > { %p2436_p12 = pnand %p2435_p9, %p2429_p8 }
  0x7b   : > { %2439 = shalt.err (!%p2436_p12)
}
  0x7c   : > { %2211 = dma.hbm_to_vmem [thread:$0]  (!%p3262_p6), %s3206_s7, 512, %s436_s28, [#allocation13], %s2638_s10, %s2638_s10, %s2639_s17  }
  0x7d   : > { %s2451_s12 = scalar_lea.vmem %s450_s15, 16  ;;  %s2458_s13 = scalar_lea.vmem %s450_s15, 32 }
  0x7e   : > { %p2452_p0 = scmp.ne.s32.totalorder %s450_s15, %s2451_s12  ;;  %p2459_p3 = scmp.lt.s32.totalorder %s450_s15, %s450_s15 }
  0x7f   : > { %p2460_p7 = scmp.lt.s32.totalorder %s2458_s13, %s2451_s12 }
  0x80   : > { %p2454_p2 = pnand %p2452_p0, %p3261_p11 }
  0x81   : > { %p2461_p13 = por %p2460_p7, %p2459_p3 }
  0x82   : > { %p2455_p5 = pneg %p2454_p2 }
  0x84   : > { %p2462_p4 = pnand %p2461_p13, %p2455_p5 }
  0x86   : > { %2465 = shalt.err (!%p2462_p4)
}
  0x87   : > { %2214 = dma.hbm_to_vmem [thread:$0]  (!%p3262_p6), %s3207_s8, 16, %s450_s15, [#allocation16]  }
  0x88   : > { %s3263_s24 = sshll.u32 %s2632_s16, 7  ;;  %s3264_s0 = sld [smem:[#allocation33_spill]] }
  0x89   : > { %s3265_s21 = sshll.u32 %s2813_s22, 3  ;;  %s1989_s29 = sshll.u32 %s2632_s16, 4 }
  0x8a   : > { %s476_s23 = scalar_lea.vmem [#allocation3], %s3265_s21  ;;  %s473_s12 = scalar_lea.sflag [#allocation4], %s2813_s22 }
  0x8b   : > { %s483_s4 = sshll.u32 %s476_s23, 4  ;;  %p3266_p8 = scmp.ne.s32.totalorder %s3260_s26, 0  ;;  %s484_s4 = int_to_ptr.vmem [resolvable:$true] %s483_s4 }
  0x8e   : > { %s2896_s28 = scalar_lea.hbm %s3264_s0, %s3263_s24  ;;  %s2471_s18 = scalar_lea.hbm %s3264_s0, 256 }
  0x8f   : > { %s2466_s13 = scalar_lea.hbm %s2896_s28, 128  ;;  %p2472_p9 = scmp.lt.s32.totalorder %s2896_s28, %s3264_s0 }
  0x90   : > { %p2467_p11 = scmp.ne.s32.totalorder %s2896_s28, %s2466_s13  ;;  %p2473_p12 = scmp.lt.s32.totalorder %s2471_s18, %s2466_s13 }
  0x92   : > { %p2469_p10 = pnand %p2467_p11, %p3266_p8  ;;  %p2474_p0 = por %p2473_p12, %p2472_p9 }
  0x94   : > { %p2470_p6 = pneg %p2469_p10 }
  0x96   : > { %p2475_p2 = pnand %p2474_p0, %p2470_p6 }
  0x98   : > { %2478 = shalt.err (!%p2475_p2)
}
  0x99   : > { %s2479_s17 = scalar_lea.vmem %s484_s4, 128  ;;  %s2642_s21 = smov [#allocation3]  }
  0x9a   : > { %p2480_p5 = scmp.ne.s32.totalorder %s484_s4, %s2479_s17  ;;  %s2484_s23 = sshll.u32 %s2642_s21, 4  ;;  %s2485_s23 = int_to_ptr.vmem [resolvable:$false] %s2484_s23 }
  0x9b   : > { %s2486_s1 = scalar_lea.vmem %s2485_s23, 256  ;;  %p2487_p13 = scmp.lt.s32.totalorder %s484_s4, %s2485_s23 }
  0x9c   : > { %p2482_p3 = pnand %p2480_p5, %p3266_p8  ;;  %p2488_p4 = scmp.lt.s32.totalorder %s2486_s1, %s2479_s17 }
  0x9e   : > { %p2483_p7 = pneg %p2482_p3  ;;  %p2489_p11 = por %p2488_p4, %p2487_p13 }
  0xa0   : > { %p2490_p10 = pnand %p2489_p11, %p2483_p7 }
  0xa2   : > { %2493 = shalt.err (!%p2490_p10)
}
  0xa3   : > { %2218 = dma.hbm_to_vmem [thread:$0]  (!%p2825_p1), %s2896_s28, 128, %s484_s4, %s473_s12  }
  0xa4   : > { %s516_s27 = scalar_lea.hbm %s3201_s2, %s1989_s29  ;;  %s511_s18 = scalar_lea.vmem [#allocation8], %s2813_s22 }
  0xa5   : > { %s518_s24 = sshll.u32 %s511_s18, 4  ;;  %s2494_s10 = scalar_lea.hbm %s516_s27, 16  ;;  %s519_s24 = int_to_ptr.vmem [resolvable:$true] %s518_s24 }
  0xa6   : > { %p2495_p6 = scmp.ne.s32.totalorder %s516_s27, %s2494_s10  ;;  %s2499_s21 = scalar_lea.hbm %s3201_s2, 32 }
  0xa7   : > { %p2500_p0 = scmp.lt.s32.totalorder %s516_s27, %s3201_s2  ;;  %p2501_p2 = scmp.lt.s32.totalorder %s2499_s21, %s2494_s10 }
  0xa8   : > { %p2497_p9 = pnand %p2495_p6, %p3266_p8 }
  0xa9   : > { %p2502_p5 = por %p2501_p2, %p2500_p0 }
  0xaa   : > { %p2498_p12 = pneg %p2497_p9 }
  0xac   : > { %p2503_p3 = pnand %p2502_p5, %p2498_p12 }
  0xae   : > { %2506 = shalt.err (!%p2503_p3)
}
  0xaf   : > { %s2507_s22 = scalar_lea.vmem %s519_s24, 16  ;;  %s2643_s28 = smov [#allocation8]  }
  0xb0   : > { %p2508_p7 = scmp.ne.s32.totalorder %s519_s24, %s2507_s22  ;;  %s2512_s4 = sshll.u32 %s2643_s28, 4  ;;  %s2513_s4 = int_to_ptr.vmem [resolvable:$false] %s2512_s4 }
  0xb1   : > { %s2514_s29 = scalar_lea.vmem %s2513_s4, 32  ;;  %p2515_p11 = scmp.lt.s32.totalorder %s519_s24, %s2513_s4 }
  0xb2   : > { %p2510_p13 = pnand %p2508_p7, %p3266_p8  ;;  %p2516_p10 = scmp.lt.s32.totalorder %s2514_s29, %s2507_s22 }
  0xb4   : > { %p2511_p4 = pneg %p2510_p13  ;;  %p2517_p6 = por %p2516_p10, %p2515_p11 }
  0xb6   : > { %p2518_p9 = pnand %p2517_p6, %p2511_p4 }
  0xb8   : > { %2521 = shalt.err (!%p2518_p9)
}
  0xb9   : > { %2224 = dma.hbm_to_vmem [thread:$0]  (!%p2825_p1), %s516_s27, 16, %s519_s24, %s2841_s14  }
  0xba   : > { %p3267_p12 = scmp.ne.s32.totalorder %s3245_s20, 0 }
  0xbb   : > { %s2938_s0 = sand.u32 (!%p3267_p12), 1, %s2624_s30   ;;  %p3268_p8 = scmp.ne.s32.totalorder (!%p3267_p12), %s3253_s25, 0 }
  0xbc   : > { %527 = sbr.rel (%p3267_p12) target bundleno = 1768 (0x6e8), region = 72  ;;  %s2941_s26 = sshll.u32 (!%p3267_p12), %s2938_s0, 3 }
  0xbd   : > { %s530_s12 = scalar_lea.sflag (!%p3267_p12), [#allocation4], %s2938_s0  ;;  %s533_s13 = scalar_lea.vmem (!%p3267_p12), [#allocation3], %s2941_s26 }
  0xc1   : > { %2591 = dma.done.wait (%p3268_p8), %s530_s12, 128  }
  0xc2   : > { %2593 = vsyncadd (%p3268_p8), %s530_s12, 4294967168  ;;  %s538_s6 = sand.u32 1, %s2751_s19   ;;  %s542_s20 = scalar_lea.vmem [#allocation6], %s2941_s26 }
  0xc3   : > { %s539_s14 = scalar_lea.sflag [#allocation7], %s538_s6 }
  0xc4   : > { %2595 = dma.done.wait (%p3268_p8), %s539_s14, 144  }
  0xc5   : > { %2597 = vsyncadd (%p3268_p8), %s539_s14, 4294967152  ;;  %s550_s15 = scalar_lea.vmem [#allocation8], %s2938_s0  ;;  %p3269_p1 = scmp.eq.s32.totalorder %s2751_s19, 0 }
  0xc7   : > { %2599 = dma.done.wait (%p3269_p1), [#allocation10], 528   ;;  %p3270_p0 = pmov %p3269_p1 }
  0xc9   : > { %2601 = vsyncadd (%p3270_p0), [#allocation10], 4294966768  ;;  %p3271_p2 = pmov %p3270_p0 }
  0xca   : > { %p3272_p5 = pmov %p3270_p0 }
  0xcb   : > { %2603 = dma.done.wait (%p3271_p2), [#allocation13], 528  }
  0xcc   : > { %2605 = vsyncadd (%p3272_p5), [#allocation13], 4294966768  ;;  %p3273_p3 = pmov %p3270_p0 }
  0xcd   : > { %p3274_p7 = pmov %p3270_p0 }
  0xce   : > { %2607 = dma.done.wait (%p3273_p3), [#allocation16], 16  }
  0xcf   : > { %2609 = vsyncadd (%p3274_p7), [#allocation16], 4294967280  ;;  %v2644_v0 = vmov 0.0   ;;  %vm2645_vm0 = vmmov 0   ;;  %v719_v1 = vld [vmem:[#allocation11 + $0x18] sm:$0xff]  ;;  %v634_v2 = vld [vmem:[%s3202_s3 + $0x18] sm:$0xff]  ;;  %v885_v33 = vlaneseq }
  0xd0   : > { %2085 = vmatprep.subr.mxu1 %v2644_v0  ;;  %2074 = vmatprep.subr.mxu0 %v2644_v0  ;;  %v718_v3 = vld [vmem:[#allocation11 + $0x10] sm:$0xff]  ;;  %v633_v4 = vld [vmem:[%s3202_s3 + $0x10] sm:$0xff]  ;;  %v632_v6 = vld [vmem:[%s3202_s3 + $0x8] sm:$0xff]  ;;  %vm642_vm1 = vcmask 261120   ;;  %vm890_vm2 = vcmask 64512   ;;  %s2646_s23 = smov 112  }
  0xd1   : > { %2093 = vmatprep.mubr.msk.f32.mxu1 %vm2645_vm0, %v2644_v0  ;;  %2082 = vmatprep.mubr.msk.f32.mxu0 %vm2645_vm0, %v2644_v0  ;;  %v717_v5 = vld [vmem:[#allocation11 + $0x8] sm:$0xff]  ;;  %v716_v7 = vld [vmem:[#allocation11] sm:$0xff]  ;;  %v631_v8 = vld [vmem:[%s3202_s3] sm:$0xff]  ;;  %s2647_s22 = smov 120   ;;  %s2648_s28 = smov 104   ;;  %v886_v35 = vshrl.u32 %v885_v33, 7 }
  0xd2   : > { %2086 = vmatpush3.msra.mxu1 %v719_v1  ;;  %2075 = vmatpush3.msra.mxu0 %v634_v2  ;;  %v629_v9 = vld [vmem:[%s533_s13] sm:$0xff]  ;;  %v630_v10 = vld [vmem:[%s542_s20] sm:$0xff]  ;;  %s1999_s4 = sshll.u32 %s2938_s0, 5  ;;  %s2649_s18 = smov 8   ;;  %vm1229_vm4 = vcmask 130112   ;;  %vm1404_vm5 = vcmask 195712  }
  0xd3   : > { %2087 = vmatprep.subr.mxu1 %v2644_v0  ;;  %2076 = vmatprep.subr.mxu0 %v2644_v0  ;;  %v803_v11 = vld [vmem:[#allocation14 + $0x18] sm:$0xff]  ;;  %v802_v12 = vld [vmem:[#allocation14 + $0x10] sm:$0xff]  ;;  %v801_v13 = vld [vmem:[#allocation14 + $0x8] sm:$0xff]  ;;  %v887_v36 = vsub.s32 0, %v886_v35  ;;  %s3059_s29 = scalar_lea.vmem [#allocation18], %s1999_s4  ;;  %s2650_s21 = smov 16  }
  0xd4   : > { %2088 = vmatpush3.msra.mxu1 %v718_v3  ;;  %2077 = vmatpush3.msra.mxu0 %v633_v4  ;;  %v800_v14 = vld [vmem:[#allocation14] sm:$0xff]  ;;  %v2002_v15 = vld [vmem:[#allocation12] ss:$0 sm:$0xff]  ;;  %v2000_v17 = vld [vmem:[#allocation9] ss:$0 sm:$0xff]  ;;  %vm1579_vm6 = vcmask 261312  }
  0xd5   : > { %2089 = vmatprep.subr.mxu1 %v2644_v0  ;;  %2078 = vmatprep.subr.mxu0 %v2644_v0  ;;  %v2004_v23 = vld [vmem:[#allocation15] ss:$0 sm:$0xff]  ;;  %v881_v34 = vld [vmem:[%s550_s15] sm:$0x1]  ;;  %v1585_v33 = vld [vmem:[%s3208_s9 + $0x18] sm:$0xff]  ;;  %s3275_s4 = sld [smem:[#allocation31_spill]] }
  0xd6   : > { %2090 = vmatpush3.msra.mxu1 %v717_v5  ;;  %2079 = vmatpush3.msra.mxu0 %v632_v6  ;;  %vm882_vm3 = vcmp.eq.s32.totalorder %v881_v34, 0  ;;  %v1584_v34 = vld [vmem:[%s3208_s9 + $0x10] sm:$0xff]  ;;  %v1583_v35 = vld [vmem:[%s3208_s9 + $0x8] sm:$0xff]  ;;  %s3276_s20 = sld [smem:[#allocation37_spill]]  ;;  %s2032_s15 = sshll.u32 %s2751_s19, 9 }
  0xd7   : > { %2091 = vmatprep.subr.mxu1 %v2644_v0  ;;  %2080 = vmatprep.subr.mxu0 %v2644_v0  ;;  %v883_v37 = vsel %vm882_vm3, -1e+30, %v2644_v0  ;;  %s1784_s25 = sshll.u32 %s3059_s29, 4  ;;  %s3277_s10 = sld [smem:[#allocation40_spill]]  ;;  %s3128_s25 = int_to_ptr.vmem [resolvable:$true] %s1784_s25 }
  0xd8   : > { %2092 = vmatpush3.msra.mxu1 %v716_v7  ;;  %2081 = vmatpush3.msra.mxu0 %v631_v8  ;;  %v888_v38 = vrot.slane %v883_v37, %v887_v36  ;;  %v1582_v37 = vld [vmem:[%s3208_s9] sm:$0xff]  ;;  %s1758_s17 = scalar_lea.sflag [#allocation19], %s2938_s0 }
  0xd9   : > { %2094 = vmatmul.mubr.msk.f32.vlgmr.msra.gmra.mxu1 %vm642_vm1, %v629_v9  ;;  %2083 = vmatmul.mubr.msk.f32.vlgmr.msra.gmra.mxu0 %vm642_vm1, %v630_v10 }
  0xda   : > { %2107 = vmatprep.subr.mxu1 %v2644_v0  ;;  %2109 = vmatprep.mubr.msk.f32.mxu1 %vm2645_vm0, %v2644_v0 }
  0xdb   : > { %2096 = vmatprep.subr.mxu0 %v2644_v0  ;;  %2104 = vmatprep.mubr.msk.f32.mxu0 %vm2645_vm0, %v2644_v0  ;;  %p3278_p4 = scmp.ne.s32.totalorder %s3275_s4, 0 }
  0xdc   : > { %2097 = vmatpush3.msra.mxu0 %v803_v11 }
  0xdd   : > { %2098 = vmatprep.subr.mxu0 %v2644_v0  ;;  %s3126_s1 = scalar_lea.hbm %s3277_s10, %s2032_s15 }
  0xde   : > { %2099 = vmatpush3.msra.mxu0 %v802_v12 }
  0xdf   : > { %2100 = vmatprep.subr.mxu0 %v2644_v0 }
  0xe0   : > { %2101 = vmatpush3.msra.mxu0 %v801_v13 }
  0xe1   : > { %2102 = vmatprep.subr.mxu0 %v2644_v0 }
  0xe2   : > { %2103 = vmatpush3.msra.mxu0 %v800_v14 }
  0xe3   : > { %2105 = vmatmul.mubr.msk.f32.vlgmr.msra.gmra.mxu0 %vm642_vm1, %v629_v9  ;;  %2117 = vmatprep.subr.mxu0 %v2644_v0 }
  0xe4   : > { %2119 = vmatprep.mubr.msk.f32.mxu0 %vm2645_vm0, %v2644_v0 }
 0x199   : > { %v796_v16 = vpop.f32.mrf.mxu1  ;;  %v712_v18 = vpop.f32.mrf.mxu0 }
 0x19a   : > { %v797_v19 = vadd.f32 %v2002_v15, %v796_v16  ;;  %v713_v22 = vadd.f32 %v2000_v17, %v712_v18 }
 0x19b   : > { %v2095_v20 = vpop.f32.mrf.mxu1  ;;  %v2084_v21 = vpop.f32.mrf.mxu0 }
 0x19c   : > { %1233 = vrot.lane.b32.xlu1 %v797_v19, %s2646_s23  ;;  %1057 = vrot.lane.b32.xlu0 %v797_v19, %s2647_s22 }
 0x19d   : > { %2108 = vmatpush3.xpose.msk.msra.mxu1 %vm890_vm2, %v797_v19 }
 0x19e   : > { %2112 = vmatprep.subr.mxu1 %v2644_v0 }
 0x1a0   : > { %2110 = vmatmul.mubr.msk.f32.vlgmr.msra.gmra.mxu1 %vm890_vm2, %v713_v22  ;;  %1231 = vrot.lane.b32.xlu1 %v713_v22, %s2646_s23 }
 0x1a1   : > { %1055 = vrot.lane.b32.xlu0 %v713_v22, %s2647_s22  ;;  %2114 = vmatprep.mubr.msk.f32.mxu1 %vm2645_vm0, %v2644_v0 }
 0x1a3   : > { %v877_v24 = vpop.f32.mrf.mxu0 }
 0x1a4   : > { %1406 = vrot.lane.b32.xlu1 %v713_v22, %s2648_s28  ;;  %v3022_v25 = vadd.f32 %v2004_v23, %v877_v24 }
 0x1a5   : > { %1408 = vrot.lane.b32.xlu0 %v797_v19, %s2648_s28  ;;  %v2106_v26 = vpop.f32.mrf.mxu0 }
 0x1a6   : > { %2113 = vmatpush3.msra.mxu1 %v3022_v25 }
 0x1a7   : > { %2122 = vmatprep.subr.mxu1 %v2644_v0 }
 0x20e   : > { %v1058_v27 = vpop.permute.xlu0 %1057  ;;  %v1234_v28 = vpop.permute.xlu1 %1233 }
 0x20f   : > { %2118 = vmatpush3.xpose.msk.msra.mxu0 %vm890_vm2, %v1058_v27 }
 0x210   : > { %2127 = vmatprep.subr.mxu0 %v2644_v0 }
 0x212   : > { %v1232_v30 = vpop.permute.xlu1 %1231 }
 0x213   : > { %v1056_v29 = vpop.permute.xlu0 %1055 }
 0x214   : > { %2120 = vmatmul.mubr.msk.f32.vlgmr.msra.gmra.mxu0 %vm890_vm2, %v1056_v29 }
 0x215   : > { %2128 = vmatpush3.xpose.msk.msra.mxu0 %vm890_vm2, %v1234_v28  ;;  %2129 = vmatprep.mubr.msk.f32.mxu0 %vm2645_vm0, %v2644_v0 }
 0x216   : > { %2137 = vmatprep.subr.mxu0 %v2644_v0  ;;  %v1407_v32 = vpop.permute.xlu1 %1406 }
 0x217   : > { %v1409_v31 = vpop.permute.xlu0 %1408 }
 0x218   : > { %2130 = vmatmul.mubr.msk.f32.vlgmr.msra.gmra.mxu0 %vm890_vm2, %v1232_v30 }
 0x219   : > { %2138 = vmatpush3.xpose.msk.msra.mxu0 %vm890_vm2, %v1409_v31  ;;  %2139 = vmatprep.mubr.msk.f32.mxu0 %vm2645_vm0, %v2644_v0 }
 0x21a   : > { %2147 = vmatprep.subr.mxu0 %v2644_v0 }
 0x21c   : > { %2140 = vmatmul.mubr.msk.f32.vlgmr.msra.gmra.mxu0 %vm890_vm2, %v1407_v32 }
 0x21d   : > { %2155 = vmatprep.mubr.msk.f32.mxu0 %vm2645_vm0, %v2644_v0  ;;  %2148 = vmatpush3.msra.mxu0 %v1585_v33 }
 0x21e   : > { %2149 = vmatprep.subr.mxu0 %v2644_v0 }
 0x21f   : > { %2150 = vmatpush3.msra.mxu0 %v1584_v34 }
 0x220   : > { %2151 = vmatprep.subr.mxu0 %v2644_v0 }
 0x221   : > { %2152 = vmatpush3.msra.mxu0 %v1583_v35 }
 0x222   : > { %2153 = vmatprep.subr.mxu0 %v2644_v0 }
 0x223   : > { %2154 = vmatpush3.msra.mxu0 %v1582_v37 }
 0x260   : > { %v963_v39 = vpop.f32.mrf.mxu1 }
 0x261   : > { %v967_v40 = vmul.f32 0.35355338, %v963_v39 }
 0x262   : > { %v2111_v41 = vpop.f32.mrf.mxu1 }
 0x263   : > { %v968_v42 = vadd.f32 %v967_v40, %v888_v38  ;;  %v1669_v40 = vld [vmem:[%s3210_s11 + $0x18] sm:$0xff]  ;;  %v1668_v41 = vld [vmem:[%s3210_s11 + $0x10] sm:$0xff] }
 0x265   : > { %v969_v43 = vsel %vm890_vm2, %v968_v42, -inf }
 0x266   : > { %970 = vmax.xlane.f32.xlu0 %v969_v43 }
 0x2d4   : > { %v1129_v44 = vpop.f32.mrf.mxu0 }
 0x2d5   : > { %v1133_v45 = vmul.f32 0.35355338, %v1129_v44 }
 0x2d6   : > { %v2121_v46 = vpop.f32.mrf.mxu0 }
 0x2d7   : > { %v1134_v47 = vadd.f32 %v1133_v45, %v888_v38 }
 0x2d8   : > { %v1305_v48 = vpop.f32.mrf.mxu0 }
 0x2d9   : > { %v1309_v49 = vmul.f32 0.35355338, %v1305_v48  ;;  %v1135_v50 = vsel %vm890_vm2, %v1134_v47, -inf }
 0x2da   : > { %1136 = vmax.xlane.f32.xlu1 %v1135_v50  ;;  %v2131_v51 = vpop.f32.mrf.mxu0  ;;  %v1666_v50 = vld [vmem:[%s3210_s11] sm:$0xff] }
 0x2db   : > { %v1310_v52 = vadd.f32 %v1309_v49, %v888_v38  ;;  %v1667_v49 = vld [vmem:[%s3210_s11 + $0x8] sm:$0xff]  ;;  %v2021_v51 = vld [vmem:[%s3276_s20] ss:$0 sm:$0xff] }
 0x2dc   : > { %v1480_v53 = vpop.f32.mrf.mxu0 }
 0x2dd   : > { %v1484_v54 = vmul.f32 0.35355338, %v1480_v53  ;;  %v1311_v55 = vsel %vm890_vm2, %v1310_v52, -inf }
 0x2de   : > { %v2141_v56 = vpop.f32.mrf.mxu0  ;;  %1312 = vmax.xlane.f32.xlu0 %v1311_v55 }
 0x2df   : > { %v1485_v57 = vadd.f32 %v1484_v54, %v888_v38 }
 0x2e1   : > { %v1486_v58 = vsel %vm890_vm2, %v1485_v57, -inf }
 0x2e2   : > { %1487 = vmax.xlane.f32.xlu0 %v1486_v58 }
 0x2eb   : > { %1149 = vrot.lane.b32.xlu1 %v3022_v25, %s2647_s22 }
 0x2ef   : > { %v971_v59 = vpop.xlane.xlu0 %970 }
 0x2f0   : > { %v972_v60 = vsub.f32 %v968_v42, %v971_v59 }
 0x2f2   : > { %v973_v61 = vmul.f32 1.442695, %v972_v60 }
 0x2f4   : > { %2292 = vpow2.f32 %v973_v61 }
 0x301   : > { %v2293_v62 = vpop.eup %2292 }
 0x302   : > { %v975_v63 = vsel %vm890_vm2, %v2293_v62, 0.0 }
 0x30f   : > { %976 = vadd.xlane.f32.xlu1 %v975_v63 }
 0x363   : > { %v1137_v1 = vpop.xlane.xlu1 %1136 }
 0x364   : > { %v1138_v2 = vsub.f32 %v1134_v47, %v1137_v1 }
 0x366   : > { %v1139_v3 = vmul.f32 1.442695, %v1138_v2 }
 0x367   : > { %v1313_v4 = vpop.xlane.xlu0 %1312  ;;  %v1150_v16 = vpop.permute.xlu1 %1149 }
 0x368   : > { %2294 = vpow2.f32 %v1139_v3  ;;  %v1314_v5 = vsub.f32 %v1310_v52, %v1313_v4 }
 0x36a   : > { %v1315_v6 = vmul.f32 1.442695, %v1314_v5 }
 0x36b   : > { %v1488_v7 = vpop.xlane.xlu0 %1487 }
 0x36c   : > { %2296 = vpow2.f32 %v1315_v6  ;;  %v1489_v8 = vsub.f32 %v1485_v57, %v1488_v7 }
 0x36e   : > { %v1490_v9 = vmul.f32 1.442695, %v1489_v8 }
 0x370   : > { %2298 = vpow2.f32 %v1490_v9 }
 0x375   : > { %v2295_v10 = vpop.eup %2294 }
 0x376   : > { %v1141_v11 = vsel %vm890_vm2, %v2295_v10, 0.0 }
 0x377   : > { %1142 = vadd.xlane.f32.xlu0 %v1141_v11 }
 0x379   : > { %v2297_v12 = vpop.eup %2296 }
 0x37a   : > { %v1317_v13 = vsel %vm890_vm2, %v2297_v12, 0.0 }
 0x37b   : > { %1318 = vadd.xlane.f32.xlu1 %v1317_v13 }
 0x37d   : > { %v2299_v14 = vpop.eup %2298 }
 0x37e   : > { %v1492_v15 = vsel %vm890_vm2, %v2299_v14, 0.0 }
 0x37f   : > { %1493 = vadd.xlane.f32.xlu0 %v1492_v15 }
 0x38c   : > { %1499 = vrot.lane.b32.xlu1 %v3022_v25, %s2648_s28 }
 0x395   : > { %1324 = vrot.lane.b32.xlu0 %v3022_v25, %s2646_s23  ;;  %s2651_s23 = smov 24  }
 0x398   : > { %v977_v17 = vpop.xlane.xlu1 %976 }
 0x399   : > { %2300 = vrcp.f32 %v977_v17 }
 0x3a6   : > { %v2301_v18 = vpop.eup %2300 }
 0x3a7   : > { %v979_v19 = vmul.f32 %v2301_v18, %v2293_v62 }
 0x3a9   : > { %980 = vst.msk [vmem:[%s3059_s29] sm:$0xff] %vm890_vm2, %v979_v19  ;;  %2115 = vmatmul.mubr.msk.f32.vlgmr.msra.gmra.mxu1 %vm890_vm2, %v979_v19 }
 0x3aa   : > { %2123 = vmatpush3.msra.mxu1 %v1150_v16  ;;  %2124 = vmatprep.mubr.msk.f32.mxu1 %vm2645_vm0, %v2644_v0 }
 0x3ab   : > { %2132 = vmatprep.subr.mxu1 %v2644_v0 }
 0x400   : > { %v1143_v20 = vpop.xlane.xlu0 %1142 }
 0x401   : > { %2302 = vrcp.f32 %v1143_v20 }
 0x404   : > { %v1319_v21 = vpop.xlane.xlu1 %1318 }
 0x405   : > { %2304 = vrcp.f32 %v1319_v21 }
 0x408   : > { %v1494_v22 = vpop.xlane.xlu0 %1493  ;;  %v1500_v28 = vpop.permute.xlu1 %1499 }
 0x409   : > { %2306 = vrcp.f32 %v1494_v22 }
 0x40c   : > { %v1325_v25 = vpop.permute.xlu0 %1324 }
 0x40e   : > { %v2303_v23 = vpop.eup %2302 }
 0x40f   : > { %v1145_v24 = vmul.f32 %v2303_v23, %v2295_v10 }
 0x411   : > { %2011 = vst.msk [vmem:[%s3059_s29 + $0x8] sm:$0xff] %vm890_vm2, %v1145_v24  ;;  %2125 = vmatmul.mubr.msk.f32.vlgmr.msra.gmra.mxu1 %vm890_vm2, %v1145_v24 }
 0x412   : > { %v2305_v26 = vpop.eup %2304  ;;  %2133 = vmatpush3.msra.mxu1 %v1325_v25  ;;  %2134 = vmatprep.mubr.msk.f32.mxu1 %vm2645_vm0, %v2644_v0 }
 0x413   : > { %2142 = vmatprep.subr.mxu1 %v2644_v0  ;;  %v1321_v27 = vmul.f32 %v2305_v26, %v2297_v12 }
 0x415   : > { %2015 = vst.msk [vmem:[%s3059_s29 + $0x10] sm:$0xff] %vm890_vm2, %v1321_v27  ;;  %2135 = vmatmul.mubr.msk.f32.vlgmr.msra.gmra.mxu1 %vm890_vm2, %v1321_v27 }
 0x416   : > { %v2307_v29 = vpop.eup %2306  ;;  %2143 = vmatpush3.msra.mxu1 %v1500_v28  ;;  %2144 = vmatprep.mubr.msk.f32.mxu1 %vm2645_vm0, %v2644_v0 }
 0x417   : > { %v1496_v30 = vmul.f32 %v2307_v29, %v2299_v14  ;;  %2158 = vmatprep.subr.mxu1 %v2644_v0 }
 0x419   : > { %2019 = vst.msk [vmem:[%s3059_s29 + $0x18] sm:$0xff] %vm890_vm2, %v1496_v30  ;;  %2145 = vmatmul.mubr.msk.f32.vlgmr.msra.gmra.mxu1 %vm890_vm2, %v1496_v30 }
 0x41a   : > { %2166 = vmatprep.mubr.msk.f32.mxu1 %vm2645_vm0, %v2644_v0  ;;  %2159 = vmatpush3.msra.mxu1 %v1669_v40 }
 0x41b   : > { %2160 = vmatprep.subr.mxu1 %v2644_v0 }
 0x41c   : > { %2161 = vmatpush3.msra.mxu1 %v1668_v41 }
 0x41d   : > { %2162 = vmatprep.subr.mxu1 %v2644_v0 }
 0x41e   : > { %2163 = vmatpush3.msra.mxu1 %v1667_v49 }
 0x41f   : > { %2164 = vmatprep.subr.mxu1 %v2644_v0 }
 0x420   : > { %2165 = vmatpush3.msra.mxu1 %v1666_v50 }
 0x469   : > { %v1050_v31 = vpop.f32.mrf.mxu1 }
 0x46a   : > { %1054 = vst.msk [vmem:[#allocation2] sm:$0xff] %vm890_vm2, %v1050_v31 }
 0x46b   : > { %v2116_v32 = vpop.f32.mrf.mxu1 }
 0x4d1   : > { %v1221_v36 = vpop.f32.mrf.mxu1 }
 0x4d2   : > { %1226 = vrot.lane.b32.xlu1 %v1221_v36, %s2649_s18 }
 0x4d3   : > { %v2126_v38 = vpop.f32.mrf.mxu1 }
 0x4d5   : > { %v1396_v39 = vpop.f32.mrf.mxu1 }
 0x4d6   : > { %1401 = vrot.lane.b32.xlu0 %v1396_v39, %s2650_s21  ;;  %s2522_s21 = scalar_lea.vmem %s3128_s25, 512 }
 0x4d7   : > { %v2136_v42 = vpop.f32.mrf.mxu1  ;;  %p2523_p13 = scmp.ne.s32.totalorder %s3128_s25, %s2522_s21 }
 0x4d9   : > { %v1571_v43 = vpop.f32.mrf.mxu1  ;;  %p2524_p11 = pnand %p2523_p13, %p3278_p4 }
 0x4da   : > { %1576 = vrot.lane.b32.xlu1 %v1571_v43, %s2651_s23  ;;  %s2652_s23 = smov [#allocation18]  }
 0x4db   : > { %v2146_v44 = vpop.f32.mrf.mxu1  ;;  %p2525_p10 = pneg %p2524_p11  ;;  %s2526_s22 = sshll.u32 %s2652_s23, 4  ;;  %s2527_s22 = int_to_ptr.vmem [resolvable:$false] %s2526_s22 }
 0x4dc   : > { %s2528_s29 = scalar_lea.vmem %s2527_s22, 1024  ;;  %p2529_p6 = scmp.lt.s32.totalorder %s3128_s25, %s2527_s22 }
 0x4dd   : > { %p2530_p9 = scmp.lt.s32.totalorder %s2528_s29, %s2522_s21 }
 0x4df   : > { %p2531_p12 = por %p2530_p9, %p2529_p6 }
 0x4e1   : > { %p2532_p8 = pnand %p2531_p12, %p2525_p10 }
 0x544   : > { %v1227_v45 = vpop.permute.xlu1 %1226 }
 0x545   : > { %1230 = vst.msk [vmem:[#allocation2] sm:$0xff] %vm1229_vm4, %v1227_v45 }
 0x548   : > { %v1402_v46 = vpop.permute.xlu0 %1401 }
 0x549   : > { %1405 = vst.msk [vmem:[#allocation2] sm:$0xff] %vm1404_vm5, %v1402_v46 }
 0x54c   : > { %v1577_v47 = vpop.permute.xlu1 %1576 }
 0x54d   : > { %1580 = vst.msk [vmem:[#allocation2] sm:$0xff] %vm1579_vm6, %v1577_v47 }
 0x554   : > { %v1581_v48 = vld [vmem:[#allocation2] sm:$0xff] }
 0x555   : > { %2156 = vmatmul.mubr.msk.f32.vlgmr.msra.gmra.mxu0 %vm642_vm1, %v1581_v48 }
 0x615   : > { %v1662_v52 = vpop.f32.mrf.mxu0 }
 0x616   : > { %v1663_v53 = vadd.f32 %v2021_v51, %v1662_v52 }
 0x617   : > { %v2157_v54 = vpop.f32.mrf.mxu0 }
 0x618   : > { %2167 = vmatmul.mubr.msk.f32.vlgmr.msra.gmra.mxu1 %vm642_vm1, %v1663_v53 }
 0x619   : > { %2535 = shalt.err (!%p2532_p8)
}
 0x61a   : > { %s2536_s28 = scalar_lea.hbm %s3126_s1, 512  ;;  %s2540_s6 = scalar_lea.hbm %s3277_s10, 1024 }
 0x61b   : > { %p2537_p1 = scmp.ne.s32.totalorder %s3126_s1, %s2536_s28  ;;  %p2541_p5 = scmp.lt.s32.totalorder %s3126_s1, %s3277_s10 }
 0x61c   : > { %p2542_p3 = scmp.lt.s32.totalorder %s2540_s6, %s2536_s28 }
 0x61d   : > { %p2538_p0 = pnand %p2537_p1, %p3278_p4 }
 0x61e   : > { %p2543_p7 = por %p2542_p3, %p2541_p5 }
 0x61f   : > { %p2539_p2 = pneg %p2538_p0 }
 0x621   : > { %p2544_p13 = pnand %p2543_p7, %p2539_p2 }
 0x623   : > { %2547 = shalt.err (!%p2544_p13)
}
 0x624   : > { %s2653_s15 = smov 128   ;;  %s3279_s21 = sld [smem:[#allocation38_spill]]  ;;  %vm1750_vm7 = vcmask 130048  }
 0x625   : > { %2196 = dma.vmem_to_hbm [thread:$0]  (%p3278_p4), %s3128_s25, 512, %s3126_s1, %s1758_s17, %s2653_s15, %s2653_s15, %s2649_s18  }
 0x626   : > { %s2027_s23 = sshll.u32 %s2751_s19, 7  ;;  %s621_s22 = scalar_lea.vmem [#allocation17], %s2941_s26 }
 0x627   : > { %s1771_s29 = sshll.u32 %s621_s22, 4  ;;  %s3280_s13 = sld [smem:[#allocation39_spill]]  ;;  %s1772_s29 = int_to_ptr.vmem [resolvable:$true] %s1771_s29 }
 0x628   : > { %s1753_s14 = scalar_lea.sflag [#allocation5], %s2938_s0  ;;  %s2548_s18 = scalar_lea.vmem %s1772_s29, 128 }
 0x629   : > { %p2549_p11 = scmp.ne.s32.totalorder %s1772_s29, %s2548_s18  ;;  %s2654_s19 = smov [#allocation17]  }
 0x62a   : > { %v2023_v0 = vld [vmem:[%s3279_s21] ss:$0 sm:$0xff]  ;;  %s2552_s26 = sshll.u32 %s2654_s19, 4  ;;  %s2553_s26 = int_to_ptr.vmem [resolvable:$false] %s2552_s26 }
 0x62b   : > { %p2550_p10 = pnand %p2549_p11, %p3278_p4  ;;  %s2554_s25 = scalar_lea.vmem %s2553_s26, 256 }
 0x62c   : > { %p2555_p9 = scmp.lt.s32.totalorder %s1772_s29, %s2553_s26  ;;  %p2556_p12 = scmp.lt.s32.totalorder %s2554_s25, %s2548_s18 }
 0x62d   : > { %s3162_s6 = scalar_lea.hbm %s3280_s13, %s2027_s23  ;;  %p2551_p6 = pneg %p2550_p10 }
 0x62e   : > { %p2557_p8 = por %p2556_p12, %p2555_p9 }
 0x630   : > { %p2558_p1 = pnand %p2557_p8, %p2551_p6 }
 0x6d8   : > { %v1746_v55 = vpop.f32.mrf.mxu1 }
 0x6d9   : > { %v1747_v56 = vadd.f32 %v2023_v0, %v1746_v55 }
 0x6da   : > { %v2168_v57 = vpop.f32.mrf.mxu1 }
 0x6db   : > { %1751 = vst.msk [vmem:[%s621_s22] sm:$0xff] %vm1750_vm7, %v1747_v56 }
 0x6dc   : > { %2561 = shalt.err (!%p2558_p1)
}
 0x6dd   : > { %s2562_s1 = scalar_lea.hbm %s3162_s6, 128  ;;  %s2566_s20 = scalar_lea.hbm %s3280_s13, 256 }
 0x6de   : > { %p2563_p0 = scmp.ne.s32.totalorder %s3162_s6, %s2562_s1  ;;  %p2567_p3 = scmp.lt.s32.totalorder %s3162_s6, %s3280_s13 }
 0x6df   : > { %p2568_p7 = scmp.lt.s32.totalorder %s2566_s20, %s2562_s1 }
 0x6e0   : > { %p2564_p2 = pnand %p2563_p0, %p3278_p4 }
 0x6e1   : > { %p2569_p13 = por %p2568_p7, %p2567_p3 }
 0x6e2   : > { %p2565_p5 = pneg %p2564_p2 }
 0x6e4   : > { %p2570_p11 = pnand %p2569_p13, %p2565_p5 }
 0x6e6   : > { %2573 = shalt.err (!%p2570_p11)
}
 0x6e7   : > { %2195 = dma.vmem_to_hbm [thread:$0]  (%p3278_p4), %s1772_s29, 128, %s3162_s6, %s1753_s14  }
 0x6e8 PF: > { %s3281_s24 = sld [smem:[#allocation27_spill]]  ;;  %p3284_p6 = scmp.ge.s32.totalorder %s2632_s16, 2 }
 0x6e9   : > { %s3282_s21 = sld [smem:[#allocation32_spill]] }
 0x6ee   : > { %s1799_s23 = sand.u32 1, %s3281_s24  }
 0x6ef   : > { %p3283_p10 = scmp.ne.s32.totalorder %s3282_s21, 0  ;;  %s1800_s22 = scalar_lea.sflag [#allocation5], %s1799_s23 }
 0x6f1   : > { %p2226_p9 = pnand %p3284_p6, %p3283_p10 }
 0x6f3   : > { %p2227_p12 = pneg %p2226_p9 }
 0x6f5   : > { %2611 = dma.done.wait (%p2227_p12), %s1800_s22, 128  }
 0x6f6   : > { %2613 = vsyncadd (%p2227_p12), %s1800_s22, 4294967168  ;;  %s1809_s28 = scalar_lea.sflag [#allocation19], %s1799_s23 }
 0x6f7   : > { %2615 = dma.done.wait (%p2227_p12), %s1809_s28, 512  }
 0x6f8   : > { %2617 = vsyncadd (%p2227_p12), %s1809_s28, 4294966784  ;;  %s3285_s16 = sld [smem:[#allocation29_spill]]  ;;  %s3288_s29 = smov %s2624_s30 }
 0x6f9   : > { %s3286_s4 = sld [smem:[#allocation28_spill]] }
 0x6fa   : > { %s3287_s15 = sld [smem:[#allocation30_spill]] }
 0x6fe   : > { %p37_p4 = scmp.ge.s32.totalorder %s3285_s16, 4  }
 0x6ff   : > { %s3289_s30 = smov %s3286_s4 }
 0x700   :  { %39 = sbr.rel (!%p37_p4) target bundleno = 21 (0x15), region = 181 }
 0x705   :  { %1814 = vsyncpa [#allocation4], 1 }
 0x706   :  { %1816 = vsyncpa [#allocation4 + $0x1], 1 }
 0x707   :  { %1817 = vsyncpa [#allocation7], 1 }
 0x708   :  { %1819 = vsyncpa [#allocation7 + $0x1], 1 }
 0x709   :  { %1820 = vsyncpa [#allocation10], 1 }
 0x70a   :  { %1821 = vsyncpa [#allocation13], 1 }
 0x70b   :  { %1822 = vsyncpa [#allocation16], 1 }
 0x70c   :  { %1823 = vsyncpa [#allocation5], 1 }
 0x70d   :  { %1825 = vsyncpa [#allocation5 + $0x1], 1 }
 0x70e   :  { %1826 = vsyncpa [#allocation19], 1 }
 0x70f   :  { %1828 = vsyncpa [#allocation19 + $0x1], 1 }

</bundles_post_ra>
